<compile_context>
chip_gen: v7x
topology: tpu7x:2x2x1
jax: 0.10.0
libtpu: 0.0.40
codegen_flags: <defaults>
</compile_context>

<pallas_src>
import jax
import jax.numpy as jnp
from jax.experimental import pallas as pl
from jax.experimental.pallas import tpu as pltpu

BN_EPS = 1e-5


def _bn_relu(z, pool_row):
    """BatchNorm1d (training mode, identity affine) + ReLU.

    One fused stats matmul: (1,N) @ (N,2H) gives [mean | E[x^2]] in a single MXU push.
    Biased variance is clamped at 0 before rsqrt (numerical safety of E[x^2]-mean^2).
    """
    h = z.shape[1]
    stats = jnp.dot(pool_row, jnp.concatenate([z, z * z], axis=-1),
                    preferred_element_type=jnp.float32)          # (1, 2H)
    mean = stats[:, :h]
    mean_sq = stats[:, h:]
    var = jnp.maximum(mean_sq - mean * mean, 0.0)
    zn = (z - mean) * jax.lax.rsqrt(var + BN_EPS)
    return jnp.maximum(zn, 0.0)


def gin_fused_kernel(adj_ref, h0_ref, w1_ref, w2_ref, wpred_ref, bpred_ref, out_ref):
    """Whole per-graph GIN forward; grid axis 0 iterates over graphs ("parallel").

    adj_ref   : (1, N_ext, N) bf16  rows[0:N] = adj + I, row N = 1/N pool row, rest zero
    h0_ref    : (1, N, H)     bf16  in-degrees in column 0, zeros elsewhere
    w1_ref    : (L, H, H)     f32   first MLP linear per GIN layer (layer 0 zero-padded rows)
    w2_ref    : (L, H, H)     f32   second MLP linear per GIN layer
    wpred_ref : ((L+1)*H, O)  f32   row-stacked prediction linears, pre-scaled by 1/(6(L+1))
    bpred_ref : (1, O)        f32   summed prediction biases, pre-scaled by 1/(6(L+1))
    out_ref   : (1, 1, O)     f32   hardsigmoid(mean-over-layers score)
    """
    _, n_ext, n = adj_ref.shape
    num_gin_layers, _, hidden = w1_ref.shape

    adj_ext = adj_ref[0]                                         # (N_ext, N) bf16
    # f32 pool row reused by the BN stats and the final standalone pooling.
    pool_row = jnp.full((1, n), 1.0 / n, dtype=jnp.float32)

    h_bf16 = h0_ref[0]                                           # (N, H) bf16
    h = h_bf16.astype(jnp.float32)
    pooled_rows = []                                             # 5 x (1, H), deferred readout

    for i in range(num_gin_layers):                              # unrolled (4 layers)
        # One bf16 MXU push: rows[0:N] = (adj + I) @ h, row N = mean-pooled h (= hidden_rep[i]).
        agg = jnp.dot(adj_ext, h_bf16, preferred_element_type=jnp.float32)   # (N_ext, H) f32
        pooled_rows.append(agg[n:n + 1, :])
        x = agg[:n, :]                                           # (N, H) f32
        z1 = jnp.dot(x, w1_ref[i], preferred_element_type=jnp.float32)
        h1 = _bn_relu(z1, pool_row)                              # MLP inner BN + ReLU
        z2 = jnp.dot(h1, w2_ref[i], preferred_element_type=jnp.float32)
        h = _bn_relu(z2, pool_row)                               # outer BN + ReLU
        h_bf16 = h.astype(jnp.bfloat16)

    # Final layer's pooled representation (hidden_rep[L]) - the only standalone pooling push.
    pooled_rows.append(jnp.dot(pool_row, h, preferred_element_type=jnp.float32))

    # Deferred readout: single (1, (L+1)H) @ ((L+1)H, O) push; weights already carry the
    # 1/(num_layers+1) mean and the /6 of hardsigmoid.
    pooled_all = jnp.concatenate(pooled_rows, axis=-1)           # (1, (L+1)*H)
    score = bpred_ref[...] + jnp.dot(pooled_all, wpred_ref[...],
                                     preferred_element_type=jnp.float32)
    out_ref[0] = jnp.clip(score + 0.5, 0.0, 1.0)                 # hardsigmoid tail


def gin_forward(adj_batch, gin_params, pred_params):
    """adj_batch: (B, N, N), adj[b, v, u] = 1 iff edge u -> v (row sums = in-degrees)."""
    batch, n, _ = adj_batch.shape
    hidden = gin_params[0][0].shape[1]
    out_dim = pred_params[0][0].shape[1]
    num_gin_layers = len(gin_params)
    num_readouts = num_gin_layers + 1
    scale = 1.0 / (6.0 * num_readouts)          # folds mean-over-layers and hardsigmoid /6

    adj_f32 = adj_batch.astype(jnp.float32)

    # adj_ext = [adj + I ; pool_row ; zero pad] per graph, stored bf16 (entries exact).
    n_ext = ((n + 1 + 7) // 8) * 8
    adj_i = adj_f32 + jnp.eye(n, dtype=jnp.float32)[None]
    pool = jnp.full((batch, 1, n), 1.0 / n, jnp.float32)
    pad = jnp.zeros((batch, n_ext - n - 1, n), jnp.float32)
    adj_ext = jnp.concatenate([adj_i, pool, pad], axis=1).astype(jnp.bfloat16)  # (B, N_ext, N)

    # h0 precomputed in the wrapper: in-degrees in column 0 of an (N, H) block.
    indeg = jnp.sum(adj_f32, axis=2, keepdims=True)                            # (B, N, 1)
    h0 = jnp.pad(indeg, ((0, 0), (0, 0), (0, hidden - 1))).astype(jnp.bfloat16)

    def pad_rows(w):  # zero-pad layer-0 weights (input_dim rows) up to hidden rows
        return jnp.pad(w, ((0, hidden - w.shape[0]), (0, 0))) if w.shape[0] < hidden else w

    w1_stack = jnp.stack([pad_rows(w1) for (w1, _) in gin_params])             # (L, H, H)
    w2_stack = jnp.stack([w2 for (_, w2) in gin_params])                       # (L, H, H)
    wpred_cat = jnp.concatenate([pad_rows(w) * scale for (w, _) in pred_params],
                                axis=0)                                        # ((L+1)*H, O)
    bpred = sum(b for (_, b) in pred_params) * scale                           # (1, O)

    out = pl.pallas_call(
        gin_fused_kernel,
        out_shape=jax.ShapeDtypeStruct((batch, 1, out_dim), jnp.float32),
        grid=(batch,),
        in_specs=[
            pl.BlockSpec((1, n_ext, n), lambda b: (b, 0, 0)),
            pl.BlockSpec((1, n, hidden), lambda b: (b, 0, 0)),
            pl.BlockSpec((num_gin_layers, hidden, hidden), lambda b: (0, 0, 0)),
            pl.BlockSpec((num_gin_layers, hidden, hidden), lambda b: (0, 0, 0)),
            pl.BlockSpec((num_readouts * hidden, out_dim), lambda b: (0, 0)),
            pl.BlockSpec((1, out_dim), lambda b: (0, 0)),
        ],
        out_specs=pl.BlockSpec((1, 1, out_dim), lambda b: (b, 0, 0)),
        compiler_params=pltpu.CompilerParams(
            dimension_semantics=("parallel",),
            vmem_limit_bytes=32 * 1024 * 1024,
        ),
    )(adj_ext, h0, w1_stack, w2_stack, wpred_cat, bpred)
    return out.reshape(batch, out_dim)


# ---------------------------------------------------------------------------
# Pure-JAX reference (mirrors the PyTorch forward directly) for validation.
# ---------------------------------------------------------------------------
def gin_reference(adj, gin_params, pred_params):
    adj = adj.astype(jnp.float32)
    h = jnp.sum(adj, axis=1, keepdims=True)                    # in-degrees
    hidden_rep = [h]
    for (w1, w2) in gin_params:
        x = h + jnp.dot(adj, h)
        z1 = jnp.dot(x, w1)
        m = jnp.mean(z1, axis=0, keepdims=True)
        v = jnp.mean((z1 - m) ** 2, axis=0, keepdims=True)
        h1 = jnp.maximum((z1 - m) * jax.lax.rsqrt(v + BN_EPS), 0.0)
        z2 = jnp.dot(h1, w2)
        m = jnp.mean(z2, axis=0, keepdims=True)
        v = jnp.mean((z2 - m) ** 2, axis=0, keepdims=True)
        h = jnp.maximum((z2 - m) * jax.lax.rsqrt(v + BN_EPS), 0.0)
        hidden_rep.append(h)
    score = jnp.zeros((1, pred_params[0][0].shape[1]), jnp.float32)
    for h_i, (w, b) in zip(hidden_rep, pred_params):
        pooled = jnp.mean(h_i, axis=0, keepdims=True)
        score = score + jnp.dot(pooled, w) + b
    score = score / float(len(hidden_rep))
    return jnp.clip(score / 6.0 + 0.5, 0.0, 1.0)


# ---------------------------------------------------------------------------
# Deterministic parameter construction (PyTorch-like Linear init; BN affine is
# default-identity and therefore folded away).
# ---------------------------------------------------------------------------
def make_params(key, input_dim, hidden_dim, output_dim, num_layers=5):
    def lin_w(k, fan_in, fan_out):
        bound = 1.0 / jnp.sqrt(float(fan_in))
        # stored as (in, out), i.e. transpose of torch's (out, in)
        return jax.random.uniform(k, (fan_in, fan_out), jnp.float32,
                                  minval=-bound, maxval=bound)

    def lin_b(k, fan_in, fan_out):
        bound = 1.0 / jnp.sqrt(float(fan_in))
        return jax.random.uniform(k, (1, fan_out), jnp.float32,
                                  minval=-bound, maxval=bound)

    keys = iter(jax.random.split(key, 64))
    gin_params = []
    for layer in range(num_layers - 1):
        in_dim = input_dim if layer == 0 else hidden_dim
        w1 = lin_w(next(keys), in_dim, hidden_dim)        # MLP linear 0, no bias
        w2 = lin_w(next(keys), hidden_dim, hidden_dim)    # MLP linear 1, no bias
        gin_params.append((w1, w2))

    pred_params = []
    for layer in range(num_layers):
        in_dim = input_dim if layer == 0 else hidden_dim
        w = lin_w(next(keys), in_dim, output_dim)
        b = lin_b(next(keys), in_dim, output_dim)
        pred_params.append((w, b))
    return gin_params, pred_params


if __name__ == "__main__":
    key = jax.random.PRNGKey(0)
    k_graph, k_params = jax.random.split(key)

    BATCH = 2            # grid axis -> one graph per grid step ("parallel")
    N_NODES = 16
    INPUT_DIM = 1        # node feature = in-degree, as in the reference forward
    HIDDEN_DIM = 32
    OUTPUT_DIM = 8

    # random directed graphs: adj[b, v, u] = 1 iff edge u -> v, no self loops
    adj = (jax.random.uniform(k_graph, (BATCH, N_NODES, N_NODES)) < 0.3).astype(jnp.float32)
    adj = adj * (1.0 - jnp.eye(N_NODES, dtype=jnp.float32))[None]

    gin_params, pred_params = make_params(k_params, INPUT_DIM, HIDDEN_DIM, OUTPUT_DIM)

    out = gin_forward(adj, gin_params, pred_params)
    out = jax.block_until_ready(out)
    assert out.shape == (BATCH, OUTPUT_DIM)
    assert bool(jnp.all(jnp.isfinite(out)))

    # validate against the straightforward (unfused, two-pass BN, all-f32) JAX reference;
    # tolerance covers bf16 aggregation / MXU default-precision differences.
    ref = jnp.concatenate(
        [gin_reference(adj[b], gin_params, pred_params) for b in range(BATCH)], axis=0)
    assert bool(jnp.allclose(out, ref, atol=5e-2)), (out, ref)

    print("KERNEL_OK")
</pallas_src>

<mosaic_0001>
module attributes {stable_mosaic.version = 11 : i64} {
  func.func @gin_fused_kernel(%arg0: i32, %arg1: memref<1x24x16xbf16, #tpu.memory_space<vmem>>, %arg2: memref<1x16x32xbf16, #tpu.memory_space<vmem>>, %arg3: memref<4x32x32xf32, #tpu.memory_space<vmem>>, %arg4: memref<4x32x32xf32, #tpu.memory_space<vmem>>, %arg5: memref<160x8xf32, #tpu.memory_space<vmem>>, %arg6: memref<1x8xf32, #tpu.memory_space<vmem>>, %arg7: memref<1x1x8xf32, #tpu.memory_space<vmem>>) attributes {dimension_semantics = [#tpu.dimension_semantics<parallel>], iteration_bounds = array<i64: 2>, scalar_prefetch = 0 : i64, scratch_operands = 0 : i64, tpu.core_type = #tpu.core_type<tc>, window_params = [{transform_indices = @transform_0, window_bounds = array<i64: 1, 24, 16>}, {transform_indices = @transform_1, window_bounds = array<i64: 1, 16, 32>}, {pipeline_mode = #tpu.pipeline_mode<synchronous>, transform_indices = @transform_2, window_bounds = array<i64: 4, 32, 32>}, {pipeline_mode = #tpu.pipeline_mode<synchronous>, transform_indices = @transform_3, window_bounds = array<i64: 4, 32, 32>}, {pipeline_mode = #tpu.pipeline_mode<synchronous>, transform_indices = @transform_4, window_bounds = array<i64: 160, 8>}, {pipeline_mode = #tpu.pipeline_mode<synchronous>, transform_indices = @transform_5, window_bounds = array<i64: 1, 8>}, {transform_indices = @transform_6, window_bounds = array<i64: 1, 1, 8>}]} {
    %c0 = arith.constant 0 : index
    %c0_0 = arith.constant 0 : index
    %c0_1 = arith.constant 0 : index
    %0 = vector.load %arg1[%c0, %c0_0, %c0_1] : memref<1x24x16xbf16, #tpu.memory_space<vmem>>, vector<1x24x16xbf16>
    %1 = vector.shape_cast %0 : vector<1x24x16xbf16> to vector<24x16xbf16>
    %cst = arith.constant 6.250000e-02 : f32
    %2 = vector.broadcast %cst : f32 to vector<1x16xf32>
    %c0_2 = arith.constant 0 : index
    %c0_3 = arith.constant 0 : index
    %c0_4 = arith.constant 0 : index
    %3 = vector.load %arg2[%c0_2, %c0_3, %c0_4] : memref<1x16x32xbf16, #tpu.memory_space<vmem>>, vector<1x16x32xbf16>
    %4 = vector.shape_cast %3 : vector<1x16x32xbf16> to vector<16x32xbf16>
    %cst_5 = arith.constant dense<0.000000e+00> : vector<24x32xf32>
    %5 = tpu.matmul %1, %4, %cst_5 {dimension_numbers = #tpu.dot_dimension_numbers<[1], [0], [0], [1], [0, 0, 1, 1], [], []>} : vector<24x16xbf16>, vector<16x32xbf16>, vector<24x32xf32> -> vector<24x32xf32>
    %6 = vector.extract_strided_slice %5 {offsets = [16, 0], sizes = [1, 32], strides = [1, 1]} : vector<24x32xf32> to vector<1x32xf32>
    %7 = vector.extract_strided_slice %5 {offsets = [0, 0], sizes = [16, 32], strides = [1, 1]} : vector<24x32xf32> to vector<16x32xf32>
    %c0_6 = arith.constant 0 : index
    %c0_7 = arith.constant 0 : index
    %c0_8 = arith.constant 0 : index
    %8 = vector.load %arg3[%c0_6, %c0_7, %c0_8] : memref<4x32x32xf32, #tpu.memory_space<vmem>>, vector<1x32x32xf32>
    %9 = vector.shape_cast %8 : vector<1x32x32xf32> to vector<32x32xf32>
    %cst_9 = arith.constant dense<0.000000e+00> : vector<16x32xf32>
    %10 = tpu.matmul %7, %9, %cst_9 {dimension_numbers = #tpu.dot_dimension_numbers<[1], [0], [0], [1], [0, 0, 1, 1], [], []>} : vector<16x32xf32>, vector<32x32xf32>, vector<16x32xf32> -> vector<16x32xf32>
    %11 = arith.mulf %10, %10 : vector<16x32xf32>
    %12 = tpu.concatenate %10, %11 in 1 : vector<16x32xf32>, vector<16x32xf32> -> vector<16x64xf32>
    %cst_10 = arith.constant dense<0.000000e+00> : vector<1x64xf32>
    %13 = tpu.matmul %2, %12, %cst_10 {dimension_numbers = #tpu.dot_dimension_numbers<[1], [0], [0], [1], [0, 0, 1, 1], [], []>} : vector<1x16xf32>, vector<16x64xf32>, vector<1x64xf32> -> vector<1x64xf32>
    %14 = vector.extract_strided_slice %13 {offsets = [0, 0], sizes = [1, 32], strides = [1, 1]} : vector<1x64xf32> to vector<1x32xf32>
    %15 = vector.extract_strided_slice %13 {offsets = [0, 32], sizes = [1, 32], strides = [1, 1]} : vector<1x64xf32> to vector<1x32xf32>
    %16 = arith.mulf %14, %14 : vector<1x32xf32>
    %17 = arith.subf %15, %16 : vector<1x32xf32>
    %cst_11 = arith.constant 0.000000e+00 : f32
    %18 = vector.broadcast %cst_11 : f32 to vector<1x32xf32>
    %19 = arith.maximumf %17, %18 : vector<1x32xf32>
    %20 = vector.broadcast %14 : vector<1x32xf32> to vector<16x32xf32>
    %21 = arith.subf %10, %20 : vector<16x32xf32>
    %cst_12 = arith.constant 9.99999974E-6 : f32
    %22 = vector.broadcast %cst_12 : f32 to vector<1x32xf32>
    %23 = arith.addf %19, %22 : vector<1x32xf32>
    %24 = math.rsqrt %23 : vector<1x32xf32>
    %25 = vector.broadcast %24 : vector<1x32xf32> to vector<16x32xf32>
    %26 = arith.mulf %21, %25 : vector<16x32xf32>
    %cst_13 = arith.constant 0.000000e+00 : f32
    %27 = vector.broadcast %cst_13 : f32 to vector<16x32xf32>
    %28 = arith.maximumf %26, %27 : vector<16x32xf32>
    %c0_14 = arith.constant 0 : index
    %c0_15 = arith.constant 0 : index
    %c0_16 = arith.constant 0 : index
    %29 = vector.load %arg4[%c0_14, %c0_15, %c0_16] : memref<4x32x32xf32, #tpu.memory_space<vmem>>, vector<1x32x32xf32>
    %30 = vector.shape_cast %29 : vector<1x32x32xf32> to vector<32x32xf32>
    %cst_17 = arith.constant dense<0.000000e+00> : vector<16x32xf32>
    %31 = tpu.matmul %28, %30, %cst_17 {dimension_numbers = #tpu.dot_dimension_numbers<[1], [0], [0], [1], [0, 0, 1, 1], [], []>} : vector<16x32xf32>, vector<32x32xf32>, vector<16x32xf32> -> vector<16x32xf32>
    %32 = arith.mulf %31, %31 : vector<16x32xf32>
    %33 = tpu.concatenate %31, %32 in 1 : vector<16x32xf32>, vector<16x32xf32> -> vector<16x64xf32>
    %cst_18 = arith.constant dense<0.000000e+00> : vector<1x64xf32>
    %34 = tpu.matmul %2, %33, %cst_18 {dimension_numbers = #tpu.dot_dimension_numbers<[1], [0], [0], [1], [0, 0, 1, 1], [], []>} : vector<1x16xf32>, vector<16x64xf32>, vector<1x64xf32> -> vector<1x64xf32>
    %35 = vector.extract_strided_slice %34 {offsets = [0, 0], sizes = [1, 32], strides = [1, 1]} : vector<1x64xf32> to vector<1x32xf32>
    %36 = vector.extract_strided_slice %34 {offsets = [0, 32], sizes = [1, 32], strides = [1, 1]} : vector<1x64xf32> to vector<1x32xf32>
    %37 = arith.mulf %35, %35 : vector<1x32xf32>
    %38 = arith.subf %36, %37 : vector<1x32xf32>
    %cst_19 = arith.constant 0.000000e+00 : f32
    %39 = vector.broadcast %cst_19 : f32 to vector<1x32xf32>
    %40 = arith.maximumf %38, %39 : vector<1x32xf32>
    %41 = vector.broadcast %35 : vector<1x32xf32> to vector<16x32xf32>
    %42 = arith.subf %31, %41 : vector<16x32xf32>
    %cst_20 = arith.constant 9.99999974E-6 : f32
    %43 = vector.broadcast %cst_20 : f32 to vector<1x32xf32>
    %44 = arith.addf %40, %43 : vector<1x32xf32>
    %45 = math.rsqrt %44 : vector<1x32xf32>
    %46 = vector.broadcast %45 : vector<1x32xf32> to vector<16x32xf32>
    %47 = arith.mulf %42, %46 : vector<16x32xf32>
    %cst_21 = arith.constant 0.000000e+00 : f32
    %48 = vector.broadcast %cst_21 : f32 to vector<16x32xf32>
    %49 = arith.maximumf %47, %48 : vector<16x32xf32>
    %50 = arith.truncf %49 : vector<16x32xf32> to vector<16x32xbf16>
    %cst_22 = arith.constant dense<0.000000e+00> : vector<24x32xf32>
    %51 = tpu.matmul %1, %50, %cst_22 {dimension_numbers = #tpu.dot_dimension_numbers<[1], [0], [0], [1], [0, 0, 1, 1], [], []>} : vector<24x16xbf16>, vector<16x32xbf16>, vector<24x32xf32> -> vector<24x32xf32>
    %52 = vector.extract_strided_slice %51 {offsets = [16, 0], sizes = [1, 32], strides = [1, 1]} : vector<24x32xf32> to vector<1x32xf32>
    %53 = vector.extract_strided_slice %51 {offsets = [0, 0], sizes = [16, 32], strides = [1, 1]} : vector<24x32xf32> to vector<16x32xf32>
    %c1 = arith.constant 1 : index
    %c0_23 = arith.constant 0 : index
    %c0_24 = arith.constant 0 : index
    %54 = vector.load %arg3[%c1, %c0_23, %c0_24] : memref<4x32x32xf32, #tpu.memory_space<vmem>>, vector<1x32x32xf32>
    %55 = vector.shape_cast %54 : vector<1x32x32xf32> to vector<32x32xf32>
    %cst_25 = arith.constant dense<0.000000e+00> : vector<16x32xf32>
    %56 = tpu.matmul %53, %55, %cst_25 {dimension_numbers = #tpu.dot_dimension_numbers<[1], [0], [0], [1], [0, 0, 1, 1], [], []>} : vector<16x32xf32>, vector<32x32xf32>, vector<16x32xf32> -> vector<16x32xf32>
    %57 = arith.mulf %56, %56 : vector<16x32xf32>
    %58 = tpu.concatenate %56, %57 in 1 : vector<16x32xf32>, vector<16x32xf32> -> vector<16x64xf32>
    %cst_26 = arith.constant dense<0.000000e+00> : vector<1x64xf32>
    %59 = tpu.matmul %2, %58, %cst_26 {dimension_numbers = #tpu.dot_dimension_numbers<[1], [0], [0], [1], [0, 0, 1, 1], [], []>} : vector<1x16xf32>, vector<16x64xf32>, vector<1x64xf32> -> vector<1x64xf32>
    %60 = vector.extract_strided_slice %59 {offsets = [0, 0], sizes = [1, 32], strides = [1, 1]} : vector<1x64xf32> to vector<1x32xf32>
    %61 = vector.extract_strided_slice %59 {offsets = [0, 32], sizes = [1, 32], strides = [1, 1]} : vector<1x64xf32> to vector<1x32xf32>
    %62 = arith.mulf %60, %60 : vector<1x32xf32>
    %63 = arith.subf %61, %62 : vector<1x32xf32>
    %cst_27 = arith.constant 0.000000e+00 : f32
    %64 = vector.broadcast %cst_27 : f32 to vector<1x32xf32>
    %65 = arith.maximumf %63, %64 : vector<1x32xf32>
    %66 = vector.broadcast %60 : vector<1x32xf32> to vector<16x32xf32>
    %67 = arith.subf %56, %66 : vector<16x32xf32>
    %cst_28 = arith.constant 9.99999974E-6 : f32
    %68 = vector.broadcast %cst_28 : f32 to vector<1x32xf32>
    %69 = arith.addf %65, %68 : vector<1x32xf32>
    %70 = math.rsqrt %69 : vector<1x32xf32>
    %71 = vector.broadcast %70 : vector<1x32xf32> to vector<16x32xf32>
    %72 = arith.mulf %67, %71 : vector<16x32xf32>
    %cst_29 = arith.constant 0.000000e+00 : f32
    %73 = vector.broadcast %cst_29 : f32 to vector<16x32xf32>
    %74 = arith.maximumf %72, %73 : vector<16x32xf32>
    %c1_30 = arith.constant 1 : index
    %c0_31 = arith.constant 0 : index
    %c0_32 = arith.constant 0 : index
    %75 = vector.load %arg4[%c1_30, %c0_31, %c0_32] : memref<4x32x32xf32, #tpu.memory_space<vmem>>, vector<1x32x32xf32>
    %76 = vector.shape_cast %75 : vector<1x32x32xf32> to vector<32x32xf32>
    %cst_33 = arith.constant dense<0.000000e+00> : vector<16x32xf32>
    %77 = tpu.matmul %74, %76, %cst_33 {dimension_numbers = #tpu.dot_dimension_numbers<[1], [0], [0], [1], [0, 0, 1, 1], [], []>} : vector<16x32xf32>, vector<32x32xf32>, vector<16x32xf32> -> vector<16x32xf32>
    %78 = arith.mulf %77, %77 : vector<16x32xf32>
    %79 = tpu.concatenate %77, %78 in 1 : vector<16x32xf32>, vector<16x32xf32> -> vector<16x64xf32>
    %cst_34 = arith.constant dense<0.000000e+00> : vector<1x64xf32>
    %80 = tpu.matmul %2, %79, %cst_34 {dimension_numbers = #tpu.dot_dimension_numbers<[1], [0], [0], [1], [0, 0, 1, 1], [], []>} : vector<1x16xf32>, vector<16x64xf32>, vector<1x64xf32> -> vector<1x64xf32>
    %81 = vector.extract_strided_slice %80 {offsets = [0, 0], sizes = [1, 32], strides = [1, 1]} : vector<1x64xf32> to vector<1x32xf32>
    %82 = vector.extract_strided_slice %80 {offsets = [0, 32], sizes = [1, 32], strides = [1, 1]} : vector<1x64xf32> to vector<1x32xf32>
    %83 = arith.mulf %81, %81 : vector<1x32xf32>
    %84 = arith.subf %82, %83 : vector<1x32xf32>
    %cst_35 = arith.constant 0.000000e+00 : f32
    %85 = vector.broadcast %cst_35 : f32 to vector<1x32xf32>
    %86 = arith.maximumf %84, %85 : vector<1x32xf32>
    %87 = vector.broadcast %81 : vector<1x32xf32> to vector<16x32xf32>
    %88 = arith.subf %77, %87 : vector<16x32xf32>
    %cst_36 = arith.constant 9.99999974E-6 : f32
    %89 = vector.broadcast %cst_36 : f32 to vector<1x32xf32>
    %90 = arith.addf %86, %89 : vector<1x32xf32>
    %91 = math.rsqrt %90 : vector<1x32xf32>
    %92 = vector.broadcast %91 : vector<1x32xf32> to vector<16x32xf32>
    %93 = arith.mulf %88, %92 : vector<16x32xf32>
    %cst_37 = arith.constant 0.000000e+00 : f32
    %94 = vector.broadcast %cst_37 : f32 to vector<16x32xf32>
    %95 = arith.maximumf %93, %94 : vector<16x32xf32>
    %96 = arith.truncf %95 : vector<16x32xf32> to vector<16x32xbf16>
    %cst_38 = arith.constant dense<0.000000e+00> : vector<24x32xf32>
    %97 = tpu.matmul %1, %96, %cst_38 {dimension_numbers = #tpu.dot_dimension_numbers<[1], [0], [0], [1], [0, 0, 1, 1], [], []>} : vector<24x16xbf16>, vector<16x32xbf16>, vector<24x32xf32> -> vector<24x32xf32>
    %98 = vector.extract_strided_slice %97 {offsets = [16, 0], sizes = [1, 32], strides = [1, 1]} : vector<24x32xf32> to vector<1x32xf32>
    %99 = vector.extract_strided_slice %97 {offsets = [0, 0], sizes = [16, 32], strides = [1, 1]} : vector<24x32xf32> to vector<16x32xf32>
    %c2 = arith.constant 2 : index
    %c0_39 = arith.constant 0 : index
    %c0_40 = arith.constant 0 : index
    %100 = vector.load %arg3[%c2, %c0_39, %c0_40] : memref<4x32x32xf32, #tpu.memory_space<vmem>>, vector<1x32x32xf32>
    %101 = vector.shape_cast %100 : vector<1x32x32xf32> to vector<32x32xf32>
    %cst_41 = arith.constant dense<0.000000e+00> : vector<16x32xf32>
    %102 = tpu.matmul %99, %101, %cst_41 {dimension_numbers = #tpu.dot_dimension_numbers<[1], [0], [0], [1], [0, 0, 1, 1], [], []>} : vector<16x32xf32>, vector<32x32xf32>, vector<16x32xf32> -> vector<16x32xf32>
    %103 = arith.mulf %102, %102 : vector<16x32xf32>
    %104 = tpu.concatenate %102, %103 in 1 : vector<16x32xf32>, vector<16x32xf32> -> vector<16x64xf32>
    %cst_42 = arith.constant dense<0.000000e+00> : vector<1x64xf32>
    %105 = tpu.matmul %2, %104, %cst_42 {dimension_numbers = #tpu.dot_dimension_numbers<[1], [0], [0], [1], [0, 0, 1, 1], [], []>} : vector<1x16xf32>, vector<16x64xf32>, vector<1x64xf32> -> vector<1x64xf32>
    %106 = vector.extract_strided_slice %105 {offsets = [0, 0], sizes = [1, 32], strides = [1, 1]} : vector<1x64xf32> to vector<1x32xf32>
    %107 = vector.extract_strided_slice %105 {offsets = [0, 32], sizes = [1, 32], strides = [1, 1]} : vector<1x64xf32> to vector<1x32xf32>
    %108 = arith.mulf %106, %106 : vector<1x32xf32>
    %109 = arith.subf %107, %108 : vector<1x32xf32>
    %cst_43 = arith.constant 0.000000e+00 : f32
    %110 = vector.broadcast %cst_43 : f32 to vector<1x32xf32>
    %111 = arith.maximumf %109, %110 : vector<1x32xf32>
    %112 = vector.broadcast %106 : vector<1x32xf32> to vector<16x32xf32>
    %113 = arith.subf %102, %112 : vector<16x32xf32>
    %cst_44 = arith.constant 9.99999974E-6 : f32
    %114 = vector.broadcast %cst_44 : f32 to vector<1x32xf32>
    %115 = arith.addf %111, %114 : vector<1x32xf32>
    %116 = math.rsqrt %115 : vector<1x32xf32>
    %117 = vector.broadcast %116 : vector<1x32xf32> to vector<16x32xf32>
    %118 = arith.mulf %113, %117 : vector<16x32xf32>
    %cst_45 = arith.constant 0.000000e+00 : f32
    %119 = vector.broadcast %cst_45 : f32 to vector<16x32xf32>
    %120 = arith.maximumf %118, %119 : vector<16x32xf32>
    %c2_46 = arith.constant 2 : index
    %c0_47 = arith.constant 0 : index
    %c0_48 = arith.constant 0 : index
    %121 = vector.load %arg4[%c2_46, %c0_47, %c0_48] : memref<4x32x32xf32, #tpu.memory_space<vmem>>, vector<1x32x32xf32>
    %122 = vector.shape_cast %121 : vector<1x32x32xf32> to vector<32x32xf32>
    %cst_49 = arith.constant dense<0.000000e+00> : vector<16x32xf32>
    %123 = tpu.matmul %120, %122, %cst_49 {dimension_numbers = #tpu.dot_dimension_numbers<[1], [0], [0], [1], [0, 0, 1, 1], [], []>} : vector<16x32xf32>, vector<32x32xf32>, vector<16x32xf32> -> vector<16x32xf32>
    %124 = arith.mulf %123, %123 : vector<16x32xf32>
    %125 = tpu.concatenate %123, %124 in 1 : vector<16x32xf32>, vector<16x32xf32> -> vector<16x64xf32>
    %cst_50 = arith.constant dense<0.000000e+00> : vector<1x64xf32>
    %126 = tpu.matmul %2, %125, %cst_50 {dimension_numbers = #tpu.dot_dimension_numbers<[1], [0], [0], [1], [0, 0, 1, 1], [], []>} : vector<1x16xf32>, vector<16x64xf32>, vector<1x64xf32> -> vector<1x64xf32>
    %127 = vector.extract_strided_slice %126 {offsets = [0, 0], sizes = [1, 32], strides = [1, 1]} : vector<1x64xf32> to vector<1x32xf32>
    %128 = vector.extract_strided_slice %126 {offsets = [0, 32], sizes = [1, 32], strides = [1, 1]} : vector<1x64xf32> to vector<1x32xf32>
    %129 = arith.mulf %127, %127 : vector<1x32xf32>
    %130 = arith.subf %128, %129 : vector<1x32xf32>
    %cst_51 = arith.constant 0.000000e+00 : f32
    %131 = vector.broadcast %cst_51 : f32 to vector<1x32xf32>
    %132 = arith.maximumf %130, %131 : vector<1x32xf32>
    %133 = vector.broadcast %127 : vector<1x32xf32> to vector<16x32xf32>
    %134 = arith.subf %123, %133 : vector<16x32xf32>
    %cst_52 = arith.constant 9.99999974E-6 : f32
    %135 = vector.broadcast %cst_52 : f32 to vector<1x32xf32>
    %136 = arith.addf %132, %135 : vector<1x32xf32>
    %137 = math.rsqrt %136 : vector<1x32xf32>
    %138 = vector.broadcast %137 : vector<1x32xf32> to vector<16x32xf32>
    %139 = arith.mulf %134, %138 : vector<16x32xf32>
    %cst_53 = arith.constant 0.000000e+00 : f32
    %140 = vector.broadcast %cst_53 : f32 to vector<16x32xf32>
    %141 = arith.maximumf %139, %140 : vector<16x32xf32>
    %142 = arith.truncf %141 : vector<16x32xf32> to vector<16x32xbf16>
    %cst_54 = arith.constant dense<0.000000e+00> : vector<24x32xf32>
    %143 = tpu.matmul %1, %142, %cst_54 {dimension_numbers = #tpu.dot_dimension_numbers<[1], [0], [0], [1], [0, 0, 1, 1], [], []>} : vector<24x16xbf16>, vector<16x32xbf16>, vector<24x32xf32> -> vector<24x32xf32>
    %144 = vector.extract_strided_slice %143 {offsets = [16, 0], sizes = [1, 32], strides = [1, 1]} : vector<24x32xf32> to vector<1x32xf32>
    %145 = vector.extract_strided_slice %143 {offsets = [0, 0], sizes = [16, 32], strides = [1, 1]} : vector<24x32xf32> to vector<16x32xf32>
    %c3 = arith.constant 3 : index
    %c0_55 = arith.constant 0 : index
    %c0_56 = arith.constant 0 : index
    %146 = vector.load %arg3[%c3, %c0_55, %c0_56] : memref<4x32x32xf32, #tpu.memory_space<vmem>>, vector<1x32x32xf32>
    %147 = vector.shape_cast %146 : vector<1x32x32xf32> to vector<32x32xf32>
    %cst_57 = arith.constant dense<0.000000e+00> : vector<16x32xf32>
    %148 = tpu.matmul %145, %147, %cst_57 {dimension_numbers = #tpu.dot_dimension_numbers<[1], [0], [0], [1], [0, 0, 1, 1], [], []>} : vector<16x32xf32>, vector<32x32xf32>, vector<16x32xf32> -> vector<16x32xf32>
    %149 = arith.mulf %148, %148 : vector<16x32xf32>
    %150 = tpu.concatenate %148, %149 in 1 : vector<16x32xf32>, vector<16x32xf32> -> vector<16x64xf32>
    %cst_58 = arith.constant dense<0.000000e+00> : vector<1x64xf32>
    %151 = tpu.matmul %2, %150, %cst_58 {dimension_numbers = #tpu.dot_dimension_numbers<[1], [0], [0], [1], [0, 0, 1, 1], [], []>} : vector<1x16xf32>, vector<16x64xf32>, vector<1x64xf32> -> vector<1x64xf32>
    %152 = vector.extract_strided_slice %151 {offsets = [0, 0], sizes = [1, 32], strides = [1, 1]} : vector<1x64xf32> to vector<1x32xf32>
    %153 = vector.extract_strided_slice %151 {offsets = [0, 32], sizes = [1, 32], strides = [1, 1]} : vector<1x64xf32> to vector<1x32xf32>
    %154 = arith.mulf %152, %152 : vector<1x32xf32>
    %155 = arith.subf %153, %154 : vector<1x32xf32>
    %cst_59 = arith.constant 0.000000e+00 : f32
    %156 = vector.broadcast %cst_59 : f32 to vector<1x32xf32>
    %157 = arith.maximumf %155, %156 : vector<1x32xf32>
    %158 = vector.broadcast %152 : vector<1x32xf32> to vector<16x32xf32>
    %159 = arith.subf %148, %158 : vector<16x32xf32>
    %cst_60 = arith.constant 9.99999974E-6 : f32
    %160 = vector.broadcast %cst_60 : f32 to vector<1x32xf32>
    %161 = arith.addf %157, %160 : vector<1x32xf32>
    %162 = math.rsqrt %161 : vector<1x32xf32>
    %163 = vector.broadcast %162 : vector<1x32xf32> to vector<16x32xf32>
    %164 = arith.mulf %159, %163 : vector<16x32xf32>
    %cst_61 = arith.constant 0.000000e+00 : f32
    %165 = vector.broadcast %cst_61 : f32 to vector<16x32xf32>
    %166 = arith.maximumf %164, %165 : vector<16x32xf32>
    %c3_62 = arith.constant 3 : index
    %c0_63 = arith.constant 0 : index
    %c0_64 = arith.constant 0 : index
    %167 = vector.load %arg4[%c3_62, %c0_63, %c0_64] : memref<4x32x32xf32, #tpu.memory_space<vmem>>, vector<1x32x32xf32>
    %168 = vector.shape_cast %167 : vector<1x32x32xf32> to vector<32x32xf32>
    %cst_65 = arith.constant dense<0.000000e+00> : vector<16x32xf32>
    %169 = tpu.matmul %166, %168, %cst_65 {dimension_numbers = #tpu.dot_dimension_numbers<[1], [0], [0], [1], [0, 0, 1, 1], [], []>} : vector<16x32xf32>, vector<32x32xf32>, vector<16x32xf32> -> vector<16x32xf32>
    %170 = arith.mulf %169, %169 : vector<16x32xf32>
    %171 = tpu.concatenate %169, %170 in 1 : vector<16x32xf32>, vector<16x32xf32> -> vector<16x64xf32>
    %cst_66 = arith.constant dense<0.000000e+00> : vector<1x64xf32>
    %172 = tpu.matmul %2, %171, %cst_66 {dimension_numbers = #tpu.dot_dimension_numbers<[1], [0], [0], [1], [0, 0, 1, 1], [], []>} : vector<1x16xf32>, vector<16x64xf32>, vector<1x64xf32> -> vector<1x64xf32>
    %173 = vector.extract_strided_slice %172 {offsets = [0, 0], sizes = [1, 32], strides = [1, 1]} : vector<1x64xf32> to vector<1x32xf32>
    %174 = vector.extract_strided_slice %172 {offsets = [0, 32], sizes = [1, 32], strides = [1, 1]} : vector<1x64xf32> to vector<1x32xf32>
    %175 = arith.mulf %173, %173 : vector<1x32xf32>
    %176 = arith.subf %174, %175 : vector<1x32xf32>
    %cst_67 = arith.constant 0.000000e+00 : f32
    %177 = vector.broadcast %cst_67 : f32 to vector<1x32xf32>
    %178 = arith.maximumf %176, %177 : vector<1x32xf32>
    %179 = vector.broadcast %173 : vector<1x32xf32> to vector<16x32xf32>
    %180 = arith.subf %169, %179 : vector<16x32xf32>
    %cst_68 = arith.constant 9.99999974E-6 : f32
    %181 = vector.broadcast %cst_68 : f32 to vector<1x32xf32>
    %182 = arith.addf %178, %181 : vector<1x32xf32>
    %183 = math.rsqrt %182 : vector<1x32xf32>
    %184 = vector.broadcast %183 : vector<1x32xf32> to vector<16x32xf32>
    %185 = arith.mulf %180, %184 : vector<16x32xf32>
    %cst_69 = arith.constant 0.000000e+00 : f32
    %186 = vector.broadcast %cst_69 : f32 to vector<16x32xf32>
    %187 = arith.maximumf %185, %186 : vector<16x32xf32>
    %cst_70 = arith.constant dense<0.000000e+00> : vector<1x32xf32>
    %188 = tpu.matmul %2, %187, %cst_70 {dimension_numbers = #tpu.dot_dimension_numbers<[1], [0], [0], [1], [0, 0, 1, 1], [], []>} : vector<1x16xf32>, vector<16x32xf32>, vector<1x32xf32> -> vector<1x32xf32>
    %189 = tpu.concatenate %6, %52, %98, %144, %188 in 1 : vector<1x32xf32>, vector<1x32xf32>, vector<1x32xf32>, vector<1x32xf32>, vector<1x32xf32> -> vector<1x160xf32>
    %c0_71 = arith.constant 0 : index
    %c0_72 = arith.constant 0 : index
    %190 = vector.load %arg6[%c0_71, %c0_72] : memref<1x8xf32, #tpu.memory_space<vmem>>, vector<1x8xf32>
    %c0_73 = arith.constant 0 : index
    %c0_74 = arith.constant 0 : index
    %191 = vector.load %arg5[%c0_73, %c0_74] : memref<160x8xf32, #tpu.memory_space<vmem>>, vector<160x8xf32>
    %cst_75 = arith.constant dense<0.000000e+00> : vector<1x8xf32>
    %192 = tpu.matmul %189, %191, %cst_75 {dimension_numbers = #tpu.dot_dimension_numbers<[1], [0], [0], [1], [0, 0, 1, 1], [], []>} : vector<1x160xf32>, vector<160x8xf32>, vector<1x8xf32> -> vector<1x8xf32>
    %193 = arith.addf %190, %192 : vector<1x8xf32>
    %cst_76 = arith.constant 5.000000e-01 : f32
    %194 = vector.broadcast %cst_76 : f32 to vector<1x8xf32>
    %195 = arith.addf %193, %194 : vector<1x8xf32>
    %cst_77 = arith.constant 0.000000e+00 : f32
    %cst_78 = arith.constant 1.000000e+00 : f32
    %196 = vector.broadcast %cst_77 : f32 to vector<1x8xf32>
    %197 = arith.maximumf %196, %195 : vector<1x8xf32>
    %198 = vector.broadcast %cst_78 : f32 to vector<1x8xf32>
    %199 = arith.minimumf %198, %197 : vector<1x8xf32>
    %c0_79 = arith.constant 0 : index
    %c0_80 = arith.constant 0 : index
    %c0_81 = arith.constant 0 : index
    %200 = vector.load %arg7[%c0_79, %c0_80, %c0_81] : memref<1x1x8xf32, #tpu.memory_space<vmem>>, vector<1x1x8xf32>
    %201 = vector.shape_cast %200 : vector<1x1x8xf32> to vector<1x8xf32>
    %202 = vector.shape_cast %199 : vector<1x8xf32> to vector<1x1x8xf32>
    tpu.vector_store %arg7[%c0_79, %c0_80, %c0_81], %202 {strides = array<i32>} : memref<1x1x8xf32, #tpu.memory_space<vmem>>, vector<1x1x8xf32>,
    return
  }
  func.func @transform_0(%arg0: i32) -> (i32, i32, i32) {
    %c0_i32 = arith.constant 0 : i32
    %c0_i32_0 = arith.constant 0 : i32
    %c0_i32_1 = arith.constant 0 : i32
    return %arg0, %c0_i32, %c0_i32_0 : i32, i32, i32
  }
  func.func @transform_1(%arg0: i32) -> (i32, i32, i32) {
    %c0_i32 = arith.constant 0 : i32
    %c0_i32_0 = arith.constant 0 : i32
    %c0_i32_1 = arith.constant 0 : i32
    return %arg0, %c0_i32, %c0_i32_0 : i32, i32, i32
  }
  func.func @transform_2(%arg0: i32) -> (i32, i32, i32) {
    %c0_i32 = arith.constant 0 : i32
    %c0_i32_0 = arith.constant 0 : i32
    %c0_i32_1 = arith.constant 0 : i32
    %c0_i32_2 = arith.constant 0 : i32
    return %c0_i32, %c0_i32_0, %c0_i32_1 : i32, i32, i32
  }
  func.func @transform_3(%arg0: i32) -> (i32, i32, i32) {
    %c0_i32 = arith.constant 0 : i32
    %c0_i32_0 = arith.constant 0 : i32
    %c0_i32_1 = arith.constant 0 : i32
    %c0_i32_2 = arith.constant 0 : i32
    return %c0_i32, %c0_i32_0, %c0_i32_1 : i32, i32, i32
  }
  func.func @transform_4(%arg0: i32) -> (i32, i32) {
    %c0_i32 = arith.constant 0 : i32
    %c0_i32_0 = arith.constant 0 : i32
    %c0_i32_1 = arith.constant 0 : i32
    return %c0_i32, %c0_i32_0 : i32, i32
  }
  func.func @transform_5(%arg0: i32) -> (i32, i32) {
    %c0_i32 = arith.constant 0 : i32
    %c0_i32_0 = arith.constant 0 : i32
    %c0_i32_1 = arith.constant 0 : i32
    return %c0_i32, %c0_i32_0 : i32, i32
  }
  func.func @transform_6(%arg0: i32) -> (i32, i32, i32) {
    %c0_i32 = arith.constant 0 : i32
    %c0_i32_0 = arith.constant 0 : i32
    %c0_i32_1 = arith.constant 0 : i32
    return %arg0, %c0_i32, %c0_i32_0 : i32, i32, i32
  }
}

</mosaic_0001>

<bundles_post_ra>
// kernel: tpu_custom_call.1
= control target key start
LH: loop header
LB: loop body
LE: loop exit
PB: predicated region body
PF: predicated region fallthrough
CT: control target
= control target key end

     0   :  { %11 = vsyncpa [#allocation3], 0  ;;  %s3489_s0 = inlined_call_operand.vmem [shape: bf16[2,24,16], index: 0, kind: input, shape index: {}]   ;;  %s3490_s1 = inlined_call_operand.vmem [shape: bf16[2,16,32], index: 1, kind: input, shape index: {}]   ;;  %s3491_s2 = inlined_call_operand.vmem [shape: f32[4,32,32], index: 2, kind: input, shape index: {}]   ;;  %s3492_s3 = inlined_call_operand.hbm [shape: f32[4,32,32], index: 3, kind: input, shape index: {}]   ;;  %s3493_s4 = inlined_call_operand.vmem [shape: f32[160,8], index: 4, kind: input, shape index: {}]   ;;  %s3494_s5 = inlined_call_operand.vmem [shape: f32[1,8], index: 5, kind: input, shape index: {}]   ;;  %s3495_s6 = inlined_call_operand.hbm [shape: f32[2,1,8], index: 6, kind: output, shape index: {}]  }
   0x1   :  { %12 = vsyncpa [#allocation4], 0 }
   0x2   :  { %14 = vsyncpa [#allocation4 + $0x1], 0  ;;  %s3053_s21 = smov 0   ;;  %s3055_s22 = smov 0  }
   0x3   :  { %s3057_s23 = smov 0   ;;  %s3059_s24 = smov 0  }
   0x4 LB: > { %s3074_s25 = sadd.s32 4294967295, %s3005_s24   ;;  %s2347_s26 = sadd.s32 4294967294, %s3005_s24   ;;  %s3005_s24 = sphi %s3059_s24, %s3511_s24   ;;  %s3001_s23 = sphi %s3057_s23, %s3510_s23   ;;  %s2997_s22 = sphi %s3055_s22, %s3509_s22   ;;  %s2993_s21 = sphi %s3053_s21, %s3508_s21  }
   0x5   : > { %s3078_s27 = sadd.s32 1, %s3005_s24   ;;  %s163_s28 = sadd.s32 1, %s3001_s23 }
   0x6   : > { %s160_s29 = ssub.s32 %s3005_s24, %s3078_s27  ;;  %p173_p0 = scmp.ne.s32.totalorder %s3001_s23, %s2997_s22 }
   0x7   : > { %p161_p1 = scmp.eq.s32.totalorder %s160_s29, 0  ;;  %p174_p2 = scmp.eq.s32.totalorder %s3074_s25, 1 }
   0x8   : > { %p179_p3 = scmp.ne.s32.totalorder %s2997_s22, %s2993_s21  ;;  %p180_p4 = scmp.eq.s32.totalorder %s2347_s26, 1 }
   0x9   : > { %s3089_s30 = scalar_select %p161_p1, %s3001_s23, %s163_s28  }
   0xa   : > { %p3091_p5 = por %p174_p2, %p173_p0  ;;  %p3095_p6 = por %p180_p4, %p179_p3 }
   0xb   : > { %p2348_p7 = scmp.ge.s32.totalorder %s3005_s24, 1  ;;  %p187_p8 = scmp.lt.s32.totalorder %s3005_s24, 3 }
   0xc   : > { %s3499_s7 = scalar_select %p3091_p5, 1, 0 }
   0xd   : > { %s3500_s8 = scalar_select %p3095_p6, 1, 0 }
   0xe   : > { %p3496_p9 = scmp.eq.s32.totalorder %s3074_s25, 0  ;;  %p3102_p10 = pnand %p2348_p7, %p187_p8 }
   0xf   : > { %s3007_s10 = smov [#allocation2]   ;;  %s2911_s15 = scalar_lea.hbm %s3492_s3, 2048 }
  0x10   : > { %s3501_s9 = scalar_select %p3102_p10, 1, 0 }
  0x11   : > { %s202_s11 = sshll.u32 %s3007_s10, 4  ;;  %p2799_p11 = pneg %p3102_p10  ;;  %s203_s11 = int_to_ptr.vmem [resolvable:$true] %s202_s11 }
  0x12   : > { %p2912_p13 = scmp.ne.s32.totalorder %s3492_s3, %s2911_s15  ;;  %p2918_p3 = scmp.lt.u32.totalorder %s2911_s15, %s3492_s3 }
  0x13   : > { %p3110_p12 = pnand %p3496_p9, %p2799_p11 }
  0x15   : > { %p2913_p0 = pneg %p3110_p12 }
  0x17   : > { %p2914_p1 = pnand %p2913_p0, %p2912_p13 }
  0x19   : > { %p2915_p2 = pneg %p2914_p1 }
  0x1b   : > { %p2920_p4 = pnand %p2918_p3, %p2915_p2 }
  0x1d   : > { %2923 = shalt.err (!%p2920_p4)
}
  0x1e   : > { %s2924_s20 = scalar_lea.vmem %s203_s11, 2048  ;;  %p2932_p9 = scmp.lt.s32.totalorder %s203_s11, %s203_s11 }
  0x1f   : > { %p2925_p7 = scmp.ne.s32.totalorder %s203_s11, %s2924_s20  ;;  %p2933_p6 = scmp.lt.s32.totalorder %s2924_s20, %s2924_s20 }
  0x21   : > { %p2927_p8 = pnand %p2925_p7, %p2913_p0  ;;  %p2934_p5 = por %p2933_p6, %p2932_p9 }
  0x23   : > { %p2928_p11 = pneg %p2927_p8 }
  0x25   : > { %p2935_p10 = pnand %p2934_p5, %p2928_p11 }
  0x27   : > { %2938 = shalt.err (!%p2935_p10)
}
  0x28   : > { %s3008_s26 = smov 128   ;;  %s3009_s28 = smov 8  }
  0x29   : > { %2802 = dma.hbm_to_vmem [thread:$0]  (!%p3110_p12), %s3492_s3, 2048, %s203_s11, [#allocation3], %s3008_s26, %s3008_s26, %s3009_s28  }
  0x2a   : > { %p3503_p13 = scmp.ne.s32.totalorder %s3501_s9, 0 }
  0x2b   : > { %p3504_p1 = scmp.eq.s32.totalorder (!%p3503_p13), %s3074_s25, 0 }
  0x2c   : > { %240 = sbr.rel (%p3503_p13) target bundleno = 7853 (0x1ead), region = 44 }
  0x33   : > { %2984 = dma.done.wait (%p3504_p1), [#allocation3], 2048   ;;  %p3505_p0 = pmov %p3504_p1 }
  0x34   : > { %p274_p5 = scmp.lt.s32.totalorder %s3074_s25, 1  ;;  %vm304_vm0 = vcmask 130048   ;;  %v359_v3 = vld [vmem:[%s3491_s2] sm:$0xff]  ;;  %v360_v4 = vld [vmem:[%s3491_s2 + $0x8] sm:$0xff]  ;;  %v361_v6 = vld [vmem:[%s3491_s2 + $0x10] sm:$0xff]  ;;  %vm363_vm1 = vcmask 261120   ;;  %v537_v27 = vlaneseq }
  0x35   : > { %2986 = vsyncadd (%p3505_p0), [#allocation3], 4294965248  ;;  %v2671_v5 = vpack.c.bf16 %v360_v4, %v359_v3  ;;  %v362_v7 = vld [vmem:[%s3491_s2 + $0x18] sm:$0xff]  ;;  %v3010_v13 = vmov 0.0|0.0   ;;  %vm3011_vm2 = vmmov 0   ;;  %v3012_v14 = vmov 0.0  }
  0x36   : > { %s275_s13 = scalar_select %p274_p5, %s3074_s25, 1  ;;  %v2675_v8 = vpack.c.bf16 %v362_v7, %v361_v6  ;;  %v3014_v26 = vmov 0.0625   ;;  %v538_v28 = vshrl.u32 %v537_v27, 7  ;;  %v557_v36 = vld [vmem:[#allocation2] sm:$0xff]  ;;  %v558_v37 = vld [vmem:[#allocation2 + $0x8] sm:$0xff]  ;;  %v559_v43 = vld [vmem:[#allocation2 + $0x10] sm:$0xff] }
  0x37   : > { %v2682_v38 = vpack.c.bf16 %v558_v37, %v557_v36  ;;  %v560_v44 = vld [vmem:[#allocation2 + $0x18] sm:$0xff]  ;;  %s3015_s12 = smov 96   ;;  %s3016_s29 = smov 64   ;;  %vm2151_vm3 = vcmask 523264   ;;  %vm2153_vm4 = vcmask 785408   ;;  %vm2253_vm5 = vcmask 57344  }
  0x38   : > { %s2792_s14 = smul.u32 12, %s275_s13  ;;  %s2408_s15 = sshll.u32 %s275_s13, 3  ;;  %v3176_v29 = vsub.s32 0, %v538_v28  ;;  %v2686_v45 = vpack.c.bf16 %v560_v44, %v559_v43  ;;  %v2371_v27 = vld [vmem:[%s3491_s2 + $0x30] sm:$0xff]  ;;  %v2372_v28 = vld [vmem:[%s3491_s2 + $0x38] sm:$0xff] }
  0x39   : > { %s283_s17 = scalar_lea.vmem %s3490_s1, %s2408_s15  ;;  %s3013_s15 = smov 32  }
  0x3a   : > { %s278_s9 = scalar_lea.vmem %s3489_s0, %s2792_s14  ;;  %v2892_v0 = vld [vmem:[%s283_s17] sm:$0xff]   ;;  %s272_s10 = sand.u32 1, %s2997_s22  }
  0x3b   : > { %v3144_v1 = vld [vmem:[%s278_s9] sm:$0xff]   ;;  %2496 = vmatprep.subr.bf16.mxu0 %v2892_v0  ;;  %v3146_v2 = vld [vmem:[%s278_s9 + $0x8] ss:$0 sps:$4 sm:$0xff]   ;;  %s2405_s13 = sshll.u32 %s3074_s25, 4  ;;  %s2256_s18 = scalar_lea.sflag [#allocation4], %s272_s10 }
  0x3c   : > { %2497 = vmatpush3.bf16.msra.mxu0 %v2892_v0  ;;  %2498 = vmatprep.mubr.msk.bf16.mxu0 %vm304_vm0, %v3144_v1  ;;  %s3447_s11 = scalar_lea.hbm %s3495_s6, %s2405_s13  ;;  %p3506_p9 = scmp.ne.s32.totalorder %s3499_s7, 0 }
  0x3d   : > { %2672 = vmatprep.subr.bf16.mxu0 %v2671_v5  ;;  %s3017_s25 = smov [#allocation5]  }
  0x3e   : > { %s2943_s9 = sshll.u32 %s3017_s25, 4  ;;  %s2944_s9 = int_to_ptr.vmem [resolvable:$false] %s2943_s9 }
  0x3f   : > { %2499 = vmatmul.mubr.msk.bf16.vlgmr.msra.gmra.mrb[0].mxu0 %vm304_vm0, %v3146_v2  ;;  %s2945_s19 = scalar_lea.vmem %s2944_s9, 32 }
  0x40   : > { %2674 = vmatpush3.bf16.msra.mxu0 %v2671_v5 }
  0x41   : > { %2676 = vmatprep.subr.bf16.mxu0 %v2675_v8 }
  0x44   : > { %2678 = vmatpush3.bf16.msra.mxu0 %v2675_v8 }
  0x45   : > { %2679 = vmatprep.subr.bf16.mxu0 %v3010_v13 }
 0x112   : > { %v3164_v9 = vpop.f32.mrb[0].mxu0 }
 0x113   : > { %v345_v10 = vpop.f32.mrb[1].mxu0 }
 0x114   : > { %v2501_v11 = vpop.f32.mrb[2].mxu0  ;;  %2510 = vmatprep.mubr.msk.f32.mxu0 %vm363_vm1, %v345_v10 }
 0x115   : > { %v348_v12 = vpop.f32.mrb[3].mxu0 }
 0x116   : > { %2511 = vmatmul.mubr.msk.f32.vlgmr.msra.gmra.mrb[4].mxu0 %vm363_vm1, %v348_v12 }
 0x117   : > { %2517 = vmatprep.mubr.msk.f32.mxu0 %vm3011_vm2, %v3012_v14 }
 0x1e9   : > { %v2512_v15 = vpop.f32.mrb[4].mxu0 }
 0x1ea   : > { %v436_v16 = vpop.f32.mrb[5].mxu0  ;;  %v446_v17 = vmul.f32 %v2512_v15, %v2512_v15 }
 0x1eb   : > { %v445_v18 = vmul.f32 %v436_v16, %v436_v16 }
 0x1ed   : > { %v2852_v19 = vpack.i.bf16 %v446_v17, %v445_v18 }
 0x1ef   : > { %2853 = vrot.lane.b32.xlu0 %v2852_v19, %s3013_s15 }
 0x261   : > { %v2854_v20 = vpop.permute.xlu0 %2853 }
 0x262   : > { %v2856_v21 = vunpack.i.h.bf16 %v2854_v20  ;;  %v2855_v22 = vunpack.i.l.bf16 %v2854_v20  ;;  %v2369_v20 = vld [vmem:[%s3491_s2 + $0x20] sm:$0xff] }
 0x264   : > { %v456_v23 = vsel %vm363_vm1, %v2512_v15, %v2856_v21  ;;  %v455_v24 = vsel %vm363_vm1, %v436_v16, %v2855_v22  ;;  %v2370_v21 = vld [vmem:[%s3491_s2 + $0x28] sm:$0xff] }
 0x265   : > { %v2680_v25 = vpack.c.bf16 %v456_v23, %v455_v24 }
 0x267   : > { %2681 = vmatpush3.bf16.msra.mxu0 %v2680_v25  ;;  %v2693_v25 = vpack.c.bf16 %v2370_v21, %v2369_v20 }
 0x268   : > { %2683 = vmatprep.subr.bf16.mxu0 %v2682_v38 }
 0x26a   : > { %2518 = vmatmul.mubr.msk.f32.vlgmr.msra.gmra.mrb[6].mxu0 %vm304_vm0, %v3014_v26 }
 0x26b   : > { %2685 = vmatpush3.bf16.msra.mxu0 %v2682_v38 }
 0x26c   : > { %2687 = vmatprep.subr.bf16.mxu0 %v2686_v45 }
 0x26f   : > { %2689 = vmatpush3.bf16.msra.mxu0 %v2686_v45 }
 0x270   : > { %2690 = vmatprep.subr.bf16.mxu0 %v3010_v13 }
 0x33d   : > { %v526_v30 = vpop.f32.mrb[6].mxu0 }
 0x33e   : > { %v530_v31 = vmul.f32 %v526_v30, %v526_v30  ;;  %v540_v32 = vrot.slane %v526_v30, %v3176_v29  ;;  %v2519_v33 = vpop.f32.mrb[7].mxu0 }
 0x340   : > { %532 = vrot.lane.b32.xlu0 %v530_v31, %s3013_s15  ;;  %v541_v34 = vsub.f32 %v436_v16, %v540_v32  ;;  %v542_v35 = vsub.f32 %v2512_v15, %v540_v32 }
 0x3b2   : > { %v533_v39 = vpop.permute.xlu0 %532 }
 0x3b3   : > { %v535_v40 = vsub.f32 %v526_v30, %v533_v39  ;;  %v2697_v30 = vpack.c.bf16 %v2372_v28, %v2371_v27 }
 0x3b5   : > { %v536_v41 = vmax.f32 %v535_v40, 0.0 }
 0x3b7   : > { %v543_v42 = vadd.f32 1e-05, %v536_v41 }
 0x3b9   : > { %2895 = vrsqrt.f32 %v543_v42 }
 0x3c3   : > { %v2896_v46 = vpop.eup %2895 }
 0x3c4   : > { %v548_v47 = vrot.slane %v2896_v46, %v3176_v29 }
 0x3c6   : > { %550 = vrot.lane.b32.xlu1 %v548_v47, %s3015_s12 }
 0x438   : > { %v551_v48 = vpop.permute.xlu1 %550 }
 0x439   : > { %v553_v49 = vmul.f32 %v551_v48, %v541_v34  ;;  %v554_v50 = vmul.f32 %v551_v48, %v542_v35 }
 0x43b   : > { %v555_v51 = vmax.f32 %v553_v49, 0.0  ;;  %v556_v52 = vmax.f32 %v554_v50, 0.0 }
 0x43d   : > { %2528 = vmatprep.mubr.msk.f32.mxu0 %vm363_vm1, %v555_v51 }
 0x43e   : > { %2529 = vmatmul.mubr.msk.f32.vlgmr.msra.gmra.mrb[8].mxu0 %vm363_vm1, %v556_v52  ;;  %v996_v52 = vld [vmem:[#allocation2 + $0x20] sm:$0xff] }
 0x43f   : > { %2535 = vmatprep.mubr.msk.f32.mxu0 %vm3011_vm2, %v3012_v14 }
 0x511   : > { %v2530_v53 = vpop.f32.mrb[8].mxu0 }
 0x512   : > { %v643_v54 = vmul.f32 %v2530_v53, %v2530_v53  ;;  %v633_v55 = vpop.f32.mrb[9].mxu0 }
 0x513   : > { %v642_v56 = vmul.f32 %v633_v55, %v633_v55 }
 0x515   : > { %v2857_v57 = vpack.i.bf16 %v643_v54, %v642_v56 }
 0x517   : > { %2858 = vrot.lane.b32.xlu1 %v2857_v57, %s3013_s15 }
 0x589   : > { %v2859_v58 = vpop.permute.xlu1 %2858 }
 0x58a   : > { %v2861_v59 = vunpack.i.h.bf16 %v2859_v58  ;;  %v2860_v60 = vunpack.i.l.bf16 %v2859_v58 }
 0x58c   : > { %v653_v61 = vsel %vm363_vm1, %v2530_v53, %v2861_v59  ;;  %v652_v62 = vsel %vm363_vm1, %v633_v55, %v2860_v60  ;;  %v998_v59 = vld [vmem:[#allocation2 + $0x30] sm:$0xff]  ;;  %v999_v60 = vld [vmem:[#allocation2 + $0x38] sm:$0xff] }
 0x58d   : > { %v2691_v63 = vpack.c.bf16 %v653_v61, %v652_v62  ;;  %v2708_v61 = vpack.c.bf16 %v999_v60, %v998_v59 }
 0x58f   : > { %2692 = vmatpush3.bf16.msra.mxu0 %v2691_v63 }
 0x592   : > { %2536 = vmatmul.mubr.msk.f32.vlgmr.msra.gmra.mrb[10].mxu0 %vm304_vm0, %v3014_v26 }
 0x593   : > { %2540 = vmatprep.mubr.msk.bf16.mxu0 %vm304_vm0, %v3144_v1 }
 0x665   : > { %v720_v0 = vpop.f32.mrb[10].mxu0 }
 0x666   : > { %v724_v3 = vmul.f32 %v720_v0, %v720_v0  ;;  %v734_v4 = vrot.slane %v720_v0, %v3176_v29  ;;  %v2537_v5 = vpop.f32.mrb[11].mxu0 }
 0x668   : > { %726 = vrot.lane.b32.xlu0 %v724_v3, %s3013_s15  ;;  %v735_v6 = vsub.f32 %v633_v55, %v734_v4  ;;  %v736_v7 = vsub.f32 %v2530_v53, %v734_v4  ;;  %v997_v53 = vld [vmem:[#allocation2 + $0x28] sm:$0xff] }
 0x669   : > { %v2704_v54 = vpack.c.bf16 %v997_v53, %v996_v52 }
 0x66b   : > { %2705 = vmatprep.subr.bf16.mxu1 %v2704_v54 }
 0x66c   : > { %2707 = vmatpush3.bf16.msra.mxu1 %v2704_v54 }
 0x66d   : > { %2709 = vmatprep.subr.bf16.mxu1 %v2708_v61 }
 0x670   : > { %2711 = vmatpush3.bf16.msra.mxu1 %v2708_v61 }
 0x6da   : > { %v727_v8 = vpop.permute.xlu0 %726 }
 0x6db   : > { %v729_v10 = vsub.f32 %v720_v0, %v727_v8 }
 0x6dd   : > { %v730_v11 = vmax.f32 %v729_v10, 0.0 }
 0x6df   : > { %v737_v12 = vadd.f32 1e-05, %v730_v11 }
 0x6e1   : > { %2897 = vrsqrt.f32 %v737_v12 }
 0x6eb   : > { %v2898_v15 = vpop.eup %2897 }
 0x6ec   : > { %v742_v16 = vrot.slane %v2898_v15, %v3176_v29 }
 0x6ee   : > { %744 = vrot.lane.b32.xlu1 %v742_v16, %s3015_s12 }
 0x760   : > { %v745_v17 = vpop.permute.xlu1 %744 }
 0x761   : > { %v747_v18 = vmul.f32 %v745_v17, %v735_v6  ;;  %v748_v19 = vmul.f32 %v745_v17, %v736_v7 }
 0x763   : > { %v749_v22 = vmax.f32 %v747_v18, 0.0  ;;  %v750_v23 = vmax.f32 %v748_v19, 0.0 }
 0x765   : > { %v751_v24 = vpack.c.bf16 %v750_v23, %v749_v22 }
 0x767   : > { %2538 = vmatprep.subr.bf16.mxu0 %v751_v24 }
 0x768   : > { %2539 = vmatpush3.bf16.msra.mxu0 %v751_v24 }
 0x769   : > { %2694 = vmatprep.subr.bf16.mxu0 %v2693_v25 }
 0x76b   : > { %2541 = vmatmul.mubr.msk.bf16.vlgmr.msra.gmra.mrb[12].mxu0 %vm304_vm0, %v3146_v2 }
 0x76c   : > { %2696 = vmatpush3.bf16.msra.mxu0 %v2693_v25 }
 0x76d   : > { %2698 = vmatprep.subr.bf16.mxu0 %v2697_v30 }
 0x770   : > { %2700 = vmatpush3.bf16.msra.mxu0 %v2697_v30 }
 0x771   : > { %2701 = vmatprep.subr.bf16.mxu0 %v3010_v13 }
 0x83e   : > { %v3213_v31 = vpop.f32.mrb[12].mxu0 }
 0x83f   : > { %v786_v32 = vpop.f32.mrb[13].mxu0 }
 0x840   : > { %v2543_v33 = vpop.f32.mrb[14].mxu0  ;;  %2552 = vmatprep.mubr.msk.f32.mxu0 %vm363_vm1, %v786_v32 }
 0x841   : > { %v789_v34 = vpop.f32.mrb[15].mxu0 }
 0x842   : > { %2553 = vmatmul.mubr.msk.f32.vlgmr.msra.gmra.mrb[16].mxu0 %vm363_vm1, %v789_v34 }
 0x843   : > { %2559 = vmatprep.mubr.msk.f32.mxu0 %vm3011_vm2, %v3012_v14 }
 0x915   : > { %v2554_v35 = vpop.f32.mrb[16].mxu0 }
 0x916   : > { %v887_v36 = vmul.f32 %v2554_v35, %v2554_v35  ;;  %v877_v37 = vpop.f32.mrb[17].mxu0 }
 0x917   : > { %v886_v38 = vmul.f32 %v877_v37, %v877_v37 }
 0x919   : > { %v2862_v39 = vpack.i.bf16 %v887_v36, %v886_v38  ;;  %v2382_v36 = vld [vmem:[%s3491_s2 + $0x48] sm:$0xff] }
 0x91b   : > { %2863 = vrot.lane.b32.xlu0 %v2862_v39, %s3013_s15 }
 0x98d   : > { %v2864_v40 = vpop.permute.xlu0 %2863 }
 0x98e   : > { %v2866_v41 = vunpack.i.h.bf16 %v2864_v40  ;;  %v2865_v42 = vunpack.i.l.bf16 %v2864_v40 }
 0x990   : > { %v897_v43 = vsel %vm363_vm1, %v2554_v35, %v2866_v41  ;;  %v896_v44 = vsel %vm363_vm1, %v877_v37, %v2865_v42 }
 0x991   : > { %v2702_v45 = vpack.c.bf16 %v897_v43, %v896_v44 }
 0x993   : > { %2703 = vmatpush3.bf16.msra.mxu0 %v2702_v45  ;;  %v2383_v45 = vld [vmem:[%s3491_s2 + $0x50] sm:$0xff] }
 0x994   : > { %2712 = vmatprep.subr.bf16.mxu0 %v3010_v13 }
 0x996   : > { %2560 = vmatmul.mubr.msk.f32.vlgmr.msra.gmra.mrb[18].mxu0 %vm304_vm0, %v3014_v26 }
 0x997   : > { %2577 = vmatprep.mubr.msk.f32.mxu0 %vm3011_vm2, %v3012_v14 }
 0xa69   : > { %v964_v46 = vpop.f32.mrb[18].mxu0 }
 0xa6a   : > { %v968_v47 = vmul.f32 %v964_v46, %v964_v46  ;;  %v978_v48 = vrot.slane %v964_v46, %v3176_v29  ;;  %v2561_v49 = vpop.f32.mrb[19].mxu0 }
 0xa6c   : > { %970 = vrot.lane.b32.xlu1 %v968_v47, %s3013_s15  ;;  %v979_v50 = vsub.f32 %v877_v37, %v978_v48  ;;  %v980_v51 = vsub.f32 %v2554_v35, %v978_v48  ;;  %v2381_v35 = vld [vmem:[%s3491_s2 + $0x40] sm:$0xff] }
 0xa6d   : > { %v2715_v38 = vpack.c.bf16 %v2382_v36, %v2381_v35 }
 0xa6f   : > { %2716 = vmatprep.subr.bf16.mxu1 %v2715_v38 }
 0xade   : > { %v971_v55 = vpop.permute.xlu1 %970 }
 0xadf   : > { %v973_v56 = vsub.f32 %v964_v46, %v971_v55  ;;  %v2384_v46 = vld [vmem:[%s3491_s2 + $0x58] sm:$0xff] }
 0xae0   : > { %v2719_v47 = vpack.c.bf16 %v2384_v46, %v2383_v45 }
 0xae1   : > { %v974_v57 = vmax.f32 %v973_v56, 0.0 }
 0xae3   : > { %v981_v58 = vadd.f32 1e-05, %v974_v57 }
 0xae5   : > { %2899 = vrsqrt.f32 %v981_v58 }
 0xaef   : > { %v2900_v62 = vpop.eup %2899 }
 0xaf0   : > { %v986_v63 = vrot.slane %v2900_v62, %v3176_v29 }
 0xaf2   : > { %988 = vrot.lane.b32.xlu0 %v986_v63, %s3015_s12 }
 0xb64   : > { %v989_v0 = vpop.permute.xlu0 %988 }
 0xb65   : > { %v991_v3 = vmul.f32 %v989_v0, %v979_v50  ;;  %v992_v4 = vmul.f32 %v989_v0, %v980_v51 }
 0xb67   : > { %v994_v5 = vmax.f32 %v992_v4, 0.0  ;;  %v993_v6 = vmax.f32 %v991_v3, 0.0 }
 0xb69   : > { %2570 = vmatprep.mubr.msk.f32.mxu1 %vm363_vm1, %v993_v6 }
 0xb6a   : > { %2571 = vmatmul.mubr.msk.f32.vlgmr.msra.gmra.mrb[0].mxu1 %vm363_vm1, %v994_v5 }
 0xb6b   : > { %2718 = vmatpush3.bf16.msra.mxu1 %v2715_v38 }
 0xb6c   : > { %2720 = vmatprep.subr.bf16.mxu1 %v2719_v47 }
 0xb6f   : > { %2722 = vmatpush3.bf16.msra.mxu1 %v2719_v47 }
 0xc3d   : > { %v2572_v7 = vpop.f32.mrb[0].mxu1 }
 0xc3e   : > { %v1082_v8 = vmul.f32 %v2572_v7, %v2572_v7  ;;  %v1072_v10 = vpop.f32.mrb[1].mxu1 }
 0xc3f   : > { %v1081_v11 = vmul.f32 %v1072_v10, %v1072_v10 }
 0xc41   : > { %v2867_v12 = vpack.i.bf16 %v1082_v8, %v1081_v11  ;;  %v1436_v8 = vld [vmem:[#allocation2 + $0x48] sm:$0xff] }
 0xc43   : > { %2868 = vrot.lane.b32.xlu1 %v2867_v12, %s3013_s15 }
 0xcb5   : > { %v2869_v15 = vpop.permute.xlu1 %2868 }
 0xcb6   : > { %v2871_v16 = vunpack.i.h.bf16 %v2869_v15  ;;  %v2870_v17 = vunpack.i.l.bf16 %v2869_v15 }
 0xcb8   : > { %v1092_v18 = vsel %vm363_vm1, %v2572_v7, %v2871_v16  ;;  %v1091_v19 = vsel %vm363_vm1, %v1072_v10, %v2870_v17  ;;  %v1437_v17 = vld [vmem:[#allocation2 + $0x50] sm:$0xff] }
 0xcb9   : > { %v2713_v20 = vpack.c.bf16 %v1092_v18, %v1091_v19  ;;  %v1438_v18 = vld [vmem:[#allocation2 + $0x58] sm:$0xff] }
 0xcba   : > { %v2730_v19 = vpack.c.bf16 %v1438_v18, %v1437_v17 }
 0xcbb   : > { %2714 = vmatpush3.bf16.msra.mxu0 %v2713_v20 }
 0xcbe   : > { %2578 = vmatmul.mubr.msk.f32.vlgmr.msra.gmra.mrb[20].mxu0 %vm304_vm0, %v3014_v26 }
 0xcbf   : > { %2582 = vmatprep.mubr.msk.bf16.mxu0 %vm304_vm0, %v3144_v1 }
 0xd91   : > { %v1159_v21 = vpop.f32.mrb[20].mxu0 }
 0xd92   : > { %v1163_v22 = vmul.f32 %v1159_v21, %v1159_v21  ;;  %v1173_v23 = vrot.slane %v1159_v21, %v3176_v29  ;;  %v2579_v24 = vpop.f32.mrb[21].mxu0 }
 0xd94   : > { %1165 = vrot.lane.b32.xlu0 %v1163_v22, %s3013_s15  ;;  %v1174_v25 = vsub.f32 %v1072_v10, %v1173_v23  ;;  %v1175_v27 = vsub.f32 %v2572_v7, %v1173_v23  ;;  %v1435_v7 = vld [vmem:[#allocation2 + $0x40] sm:$0xff] }
 0xd95   : > { %v2726_v10 = vpack.c.bf16 %v1436_v8, %v1435_v7 }
 0xd97   : > { %2727 = vmatprep.subr.bf16.mxu1 %v2726_v10 }
 0xe06   : > { %v1166_v28 = vpop.permute.xlu0 %1165 }
 0xe07   : > { %v1168_v30 = vsub.f32 %v1159_v21, %v1166_v28 }
 0xe09   : > { %v1169_v32 = vmax.f32 %v1168_v30, 0.0 }
 0xe0b   : > { %v1176_v33 = vadd.f32 1e-05, %v1169_v32 }
 0xe0d   : > { %2901 = vrsqrt.f32 %v1176_v33 }
 0xe17   : > { %v2902_v34 = vpop.eup %2901 }
 0xe18   : > { %v1181_v37 = vrot.slane %v2902_v34, %v3176_v29 }
 0xe1a   : > { %1183 = vrot.lane.b32.xlu1 %v1181_v37, %s3015_s12 }
 0xe8c   : > { %v1184_v39 = vpop.permute.xlu1 %1183 }
 0xe8d   : > { %v1186_v40 = vmul.f32 %v1184_v39, %v1174_v25  ;;  %v1187_v41 = vmul.f32 %v1184_v39, %v1175_v27 }
 0xe8f   : > { %v1188_v42 = vmax.f32 %v1186_v40, 0.0  ;;  %v1189_v43 = vmax.f32 %v1187_v41, 0.0 }
 0xe91   : > { %v1190_v44 = vpack.c.bf16 %v1189_v43, %v1188_v42 }
 0xe93   : > { %2580 = vmatprep.subr.bf16.mxu0 %v1190_v44 }
 0xe94   : > { %2581 = vmatpush3.bf16.msra.mxu0 %v1190_v44 }
 0xe95   : > { %2723 = vmatprep.subr.bf16.mxu0 %v3010_v13 }
 0xe97   : > { %2583 = vmatmul.mubr.msk.bf16.vlgmr.msra.gmra.mrb[24].mxu0 %vm304_vm0, %v3146_v2 }
 0xe98   : > { %2601 = vmatprep.mubr.msk.f32.mxu0 %vm3011_vm2, %v3012_v14 }
 0xf6a   : > { %v3261_v48 = vpop.f32.mrb[24].mxu0 }
 0xf6b   : > { %v1225_v49 = vpop.f32.mrb[25].mxu0 }
 0xf6c   : > { %v2585_v50 = vpop.f32.mrb[26].mxu0  ;;  %2594 = vmatprep.mubr.msk.f32.mxu1 %vm363_vm1, %v1225_v49 }
 0xf6d   : > { %v1228_v51 = vpop.f32.mrb[27].mxu0 }
 0xf6e   : > { %2595 = vmatmul.mubr.msk.f32.vlgmr.msra.gmra.mrb[2].mxu1 %vm363_vm1, %v1228_v51 }
 0xf6f   : > { %2729 = vmatpush3.bf16.msra.mxu1 %v2726_v10 }
 0xf70   : > { %2731 = vmatprep.subr.bf16.mxu1 %v2730_v19 }
 0xf73   : > { %2733 = vmatpush3.bf16.msra.mxu1 %v2730_v19 }
0x1041   : > { %v2596_v52 = vpop.f32.mrb[2].mxu1 }
0x1042   : > { %v1326_v53 = vmul.f32 %v2596_v52, %v2596_v52  ;;  %v1316_v54 = vpop.f32.mrb[3].mxu1 }
0x1043   : > { %v1325_v55 = vmul.f32 %v1316_v54, %v1316_v54 }
0x1045   : > { %v2872_v56 = vpack.i.bf16 %v1326_v53, %v1325_v55  ;;  %v2393_v53 = vld [vmem:[%s3491_s2 + $0x60] sm:$0xff] }
0x1047   : > { %2873 = vrot.lane.b32.xlu0 %v2872_v56, %s3013_s15 }
0x10b9   : > { %v2874_v57 = vpop.permute.xlu0 %2873 }
0x10ba   : > { %v2876_v58 = vunpack.i.h.bf16 %v2874_v57  ;;  %v2875_v59 = vunpack.i.l.bf16 %v2874_v57 }
0x10bc   : > { %v1336_v60 = vsel %vm363_vm1, %v2596_v52, %v2876_v58  ;;  %v1335_v61 = vsel %vm363_vm1, %v1316_v54, %v2875_v59 }
0x10bd   : > { %v2724_v62 = vpack.c.bf16 %v1336_v60, %v1335_v61 }
0x10bf   : > { %2725 = vmatpush3.bf16.msra.mxu0 %v2724_v62  ;;  %v2395_v62 = vld [vmem:[%s3491_s2 + $0x70] sm:$0xff] }
0x10c0   : > { %2734 = vmatprep.subr.bf16.mxu0 %v3010_v13 }
0x10c2   : > { %2602 = vmatmul.mubr.msk.f32.vlgmr.msra.gmra.mrb[22].mxu0 %vm304_vm0, %v3014_v26 }
0x10c3   : > { %2619 = vmatprep.mubr.msk.f32.mxu0 %vm3011_vm2, %v3012_v14 }
0x1195   : > { %v1403_v63 = vpop.f32.mrb[22].mxu0 }
0x1196   : > { %v1407_v0 = vmul.f32 %v1403_v63, %v1403_v63  ;;  %v1417_v3 = vrot.slane %v1403_v63, %v3176_v29  ;;  %v2603_v4 = vpop.f32.mrb[23].mxu0 }
0x1198   : > { %1409 = vrot.lane.b32.xlu1 %v1407_v0, %s3013_s15  ;;  %v1418_v5 = vsub.f32 %v1316_v54, %v1417_v3  ;;  %v1419_v6 = vsub.f32 %v2596_v52, %v1417_v3 }
0x120a   : > { %v1410_v11 = vpop.permute.xlu1 %1409 }
0x120b   : > { %v1412_v12 = vsub.f32 %v1403_v63, %v1410_v11  ;;  %v2396_v63 = vld [vmem:[%s3491_s2 + $0x78] sm:$0xff] }
0x120c   : > { %v2741_v0 = vpack.c.bf16 %v2396_v63, %v2395_v62 }
0x120d   : > { %v1413_v15 = vmax.f32 %v1412_v12, 0.0 }
0x120f   : > { %v1420_v16 = vadd.f32 1e-05, %v1413_v15 }
0x1211   : > { %2903 = vrsqrt.f32 %v1420_v16 }
0x121b   : > { %v2904_v20 = vpop.eup %2903 }
0x121c   : > { %v1425_v21 = vrot.slane %v2904_v20, %v3176_v29 }
0x121e   : > { %1427 = vrot.lane.b32.xlu0 %v1425_v21, %s3015_s12 }
0x1290   : > { %v1428_v22 = vpop.permute.xlu0 %1427 }
0x1291   : > { %v1430_v23 = vmul.f32 %v1428_v22, %v1418_v5  ;;  %v1431_v24 = vmul.f32 %v1428_v22, %v1419_v6 }
0x1293   : > { %v1432_v25 = vmax.f32 %v1430_v23, 0.0  ;;  %v1433_v27 = vmax.f32 %v1431_v24, 0.0 }
0x1295   : > { %2612 = vmatprep.mubr.msk.f32.mxu1 %vm363_vm1, %v1432_v25 }
0x1296   : > { %2613 = vmatmul.mubr.msk.f32.vlgmr.msra.gmra.mrb[4].mxu1 %vm363_vm1, %v1433_v27  ;;  %v1874_v27 = vld [vmem:[#allocation2 + $0x60] sm:$0xff] }
0x1369   : > { %v2614_v28 = vpop.f32.mrb[4].mxu1 }
0x136a   : > { %v1521_v30 = vmul.f32 %v2614_v28, %v2614_v28  ;;  %v1511_v32 = vpop.f32.mrb[5].mxu1 }
0x136b   : > { %v1520_v33 = vmul.f32 %v1511_v32, %v1511_v32 }
0x136d   : > { %v2877_v34 = vpack.i.bf16 %v1521_v30, %v1520_v33 }
0x136f   : > { %2878 = vrot.lane.b32.xlu1 %v2877_v34, %s3013_s15 }
0x13e1   : > { %v2879_v35 = vpop.permute.xlu1 %2878 }
0x13e2   : > { %v2881_v36 = vunpack.i.h.bf16 %v2879_v35  ;;  %v2880_v37 = vunpack.i.l.bf16 %v2879_v35 }
0x13e4   : > { %v1531_v38 = vsel %vm363_vm1, %v2614_v28, %v2881_v36  ;;  %v1530_v39 = vsel %vm363_vm1, %v1511_v32, %v2880_v37  ;;  %v1876_v36 = vld [vmem:[#allocation2 + $0x70] sm:$0xff]  ;;  %v1877_v37 = vld [vmem:[#allocation2 + $0x78] sm:$0xff] }
0x13e5   : > { %v2735_v40 = vpack.c.bf16 %v1531_v38, %v1530_v39  ;;  %v2752_v38 = vpack.c.bf16 %v1877_v37, %v1876_v36  ;;  %v2175_v36 = vld [vmem:[%s3493_s4 + $0x98] sm:$0xff] }
0x13e7   : > { %2736 = vmatpush3.bf16.msra.mxu0 %v2735_v40 }
0x13ea   : > { %2620 = vmatmul.mubr.msk.f32.vlgmr.msra.gmra.mrb[28].mxu0 %vm304_vm0, %v3014_v26 }
0x13eb   : > { %2624 = vmatprep.mubr.msk.bf16.mxu0 %vm304_vm0, %v3144_v1  ;;  %v2394_v1 = vld [vmem:[%s3491_s2 + $0x68] sm:$0xff] }
0x13ec   : > { %v2737_v55 = vpack.c.bf16 %v2394_v1, %v2393_v53 }
0x13ee   : > { %2738 = vmatprep.subr.bf16.mxu1 %v2737_v55 }
0x13ef   : > { %2740 = vmatpush3.bf16.msra.mxu1 %v2737_v55 }
0x13f0   : > { %2742 = vmatprep.subr.bf16.mxu1 %v2741_v0 }
0x13f3   : > { %2744 = vmatpush3.bf16.msra.mxu1 %v2741_v0 }
0x14bd   : > { %v1598_v41 = vpop.f32.mrb[28].mxu0 }
0x14be   : > { %v1602_v42 = vmul.f32 %v1598_v41, %v1598_v41  ;;  %v1612_v43 = vrot.slane %v1598_v41, %v3176_v29  ;;  %v2621_v44 = vpop.f32.mrb[29].mxu0 }
0x14c0   : > { %1604 = vrot.lane.b32.xlu0 %v1602_v42, %s3013_s15  ;;  %v1613_v45 = vsub.f32 %v1511_v32, %v1612_v43  ;;  %v1614_v46 = vsub.f32 %v2614_v28, %v1612_v43  ;;  %v1875_v28 = vld [vmem:[#allocation2 + $0x68] sm:$0xff] }
0x14c1   : > { %v2748_v30 = vpack.c.bf16 %v1875_v28, %v1874_v27  ;;  %v2170_v27 = vld [vmem:[%s3493_s4 + $0x70] sm:$0xff]  ;;  %v2171_v28 = vld [vmem:[%s3493_s4 + $0x78] sm:$0xff] }
0x14c3   : > { %2749 = vmatprep.subr.bf16.mxu1 %v2748_v30 }
0x1532   : > { %v1605_v47 = vpop.permute.xlu0 %1604 }
0x1533   : > { %v1607_v49 = vsub.f32 %v1598_v41, %v1605_v47 }
0x1535   : > { %v1608_v50 = vmax.f32 %v1607_v49, 0.0 }
0x1537   : > { %v1615_v51 = vadd.f32 1e-05, %v1608_v50 }
0x1539   : > { %2905 = vrsqrt.f32 %v1615_v51 }
0x1543   : > { %v2906_v52 = vpop.eup %2905 }
0x1544   : > { %v1620_v54 = vrot.slane %v2906_v52, %v3176_v29 }
0x1546   : > { %1622 = vrot.lane.b32.xlu1 %v1620_v54, %s3015_s12 }
0x15b8   : > { %v1623_v56 = vpop.permute.xlu1 %1622 }
0x15b9   : > { %v1625_v57 = vmul.f32 %v1623_v56, %v1613_v45  ;;  %v1626_v58 = vmul.f32 %v1623_v56, %v1614_v46 }
0x15bb   : > { %v1627_v59 = vmax.f32 %v1625_v57, 0.0  ;;  %v1628_v60 = vmax.f32 %v1626_v58, 0.0 }
0x15bd   : > { %v1629_v61 = vpack.c.bf16 %v1628_v60, %v1627_v59 }
0x15bf   : > { %2622 = vmatprep.subr.bf16.mxu0 %v1629_v61 }
0x15c0   : > { %2623 = vmatpush3.bf16.msra.mxu0 %v1629_v61 }
0x15c1   : > { %2745 = vmatprep.subr.bf16.mxu0 %v3010_v13 }
0x15c3   : > { %2625 = vmatmul.mubr.msk.bf16.vlgmr.msra.gmra.mrb[32].mxu0 %vm304_vm0, %v3146_v2 }
0x15c4   : > { %2643 = vmatprep.mubr.msk.f32.mxu0 %vm3011_vm2, %v3012_v14 }
0x1696   : > { %v3307_v3 = vpop.f32.mrb[32].mxu0 }
0x1697   : > { %v1664_v4 = vpop.f32.mrb[33].mxu0 }
0x1698   : > { %v2627_v5 = vpop.f32.mrb[34].mxu0  ;;  %2636 = vmatprep.mubr.msk.f32.mxu1 %vm363_vm1, %v1664_v4 }
0x1699   : > { %v1667_v2 = vpop.f32.mrb[35].mxu0  ;;  %v2156_v5 = vld [vmem:[%s3493_s4] sm:$0xff] }
0x169a   : > { %2637 = vmatmul.mubr.msk.f32.vlgmr.msra.gmra.mrb[6].mxu1 %vm363_vm1, %v1667_v2  ;;  %v2157_v2 = vld [vmem:[%s3493_s4 + $0x8] sm:$0xff] }
0x169b   : > { %2751 = vmatpush3.bf16.msra.mxu1 %v2748_v30  ;;  %v2784_v30 = vpack.c.bf16 %v2171_v28, %v2170_v27 }
0x169c   : > { %2753 = vmatprep.subr.bf16.mxu1 %v2752_v38 }
0x169f   : > { %2755 = vmatpush3.bf16.msra.mxu1 %v2752_v38 }
0x16a0   : > { %2762 = vmatprep.subr.bf16.mxu1 %v3010_v13 }
0x176d   : > { %v2638_v6 = vpop.f32.mrb[6].mxu1 }
0x176e   : > { %v1765_v7 = vmul.f32 %v2638_v6, %v2638_v6  ;;  %v1755_v8 = vpop.f32.mrb[7].mxu1 }
0x176f   : > { %v1764_v10 = vmul.f32 %v1755_v8, %v1755_v8 }
0x1771   : > { %v2882_v11 = vpack.i.bf16 %v1765_v7, %v1764_v10  ;;  %v2763_v7 = vpack.c.bf16 %v2157_v2, %v2156_v5 }
0x1773   : > { %2883 = vrot.lane.b32.xlu0 %v2882_v11, %s3013_s15  ;;  %v2160_v11 = vld [vmem:[%s3493_s4 + $0x20] sm:$0xff] }
0x17e5   : > { %v2884_v12 = vpop.permute.xlu0 %2883 }
0x17e6   : > { %v2886_v15 = vunpack.i.h.bf16 %v2884_v12  ;;  %v2885_v16 = vunpack.i.l.bf16 %v2884_v12  ;;  %v2161_v12 = vld [vmem:[%s3493_s4 + $0x28] sm:$0xff] }
0x17e8   : > { %v1775_v17 = vsel %vm363_vm1, %v2638_v6, %v2886_v15  ;;  %v1774_v18 = vsel %vm363_vm1, %v1755_v8, %v2885_v16  ;;  %v2769_v15 = vpack.c.bf16 %v2161_v12, %v2160_v11  ;;  %v2163_v16 = vld [vmem:[%s3493_s4 + $0x38] sm:$0xff] }
0x17e9   : > { %v2746_v19 = vpack.c.bf16 %v1775_v17, %v1774_v18  ;;  %v2164_v18 = vld [vmem:[%s3493_s4 + $0x40] sm:$0xff] }
0x17eb   : > { %2747 = vmatpush3.bf16.msra.mxu0 %v2746_v19 }
0x17ec   : > { %2756 = vmatprep.subr.bf16.mxu0 %v3010_v13 }
0x17ee   : > { %2644 = vmatmul.mubr.msk.f32.vlgmr.msra.gmra.mrb[30].mxu0 %vm304_vm0, %v3014_v26 }
0x17ef   : > { %2661 = vmatprep.mubr.msk.f32.mxu0 %vm3011_vm2, %v3012_v14 }
0x18c1   : > { %v1842_v20 = vpop.f32.mrb[30].mxu0 }
0x18c2   : > { %v1846_v21 = vmul.f32 %v1842_v20, %v1842_v20  ;;  %v1856_v22 = vrot.slane %v1842_v20, %v3176_v29  ;;  %v2645_v23 = vpop.f32.mrb[31].mxu0 }
0x18c3   : > { %v2168_v23 = vld [vmem:[%s3493_s4 + $0x60] sm:$0xff] }
0x18c4   : > { %1848 = vrot.lane.b32.xlu1 %v1846_v21, %s3013_s15  ;;  %v1857_v24 = vsub.f32 %v1755_v8, %v1856_v22  ;;  %v1858_v25 = vsub.f32 %v2638_v6, %v1856_v22  ;;  %v2167_v21 = vld [vmem:[%s3493_s4 + $0x58] sm:$0xff] }
0x1936   : > { %v1849_v32 = vpop.permute.xlu1 %1848 }
0x1937   : > { %v1851_v33 = vsub.f32 %v1842_v20, %v1849_v32  ;;  %v2166_v20 = vld [vmem:[%s3493_s4 + $0x50] sm:$0xff]  ;;  %v2172_v32 = vld [vmem:[%s3493_s4 + $0x80] sm:$0xff] }
0x1938   : > { %v2778_v22 = vpack.c.bf16 %v2167_v21, %v2166_v20 }
0x1939   : > { %v1852_v34 = vmax.f32 %v1851_v33, 0.0  ;;  %v2173_v33 = vld [vmem:[%s3493_s4 + $0x88] sm:$0xff] }
0x193b   : > { %v1859_v35 = vadd.f32 1e-05, %v1852_v34  ;;  %v2787_v34 = vpack.c.bf16 %v2173_v33, %v2172_v32 }
0x193d   : > { %2907 = vrsqrt.f32 %v1859_v35  ;;  %v2174_v35 = vld [vmem:[%s3493_s4 + $0x90] sm:$0xff] }
0x193e   : > { %v2790_v37 = vpack.c.bf16 %v2175_v36, %v2174_v35 }
0x1947   : > { %v2908_v39 = vpop.eup %2907 }
0x1948   : > { %v1864_v40 = vrot.slane %v2908_v39, %v3176_v29 }
0x194a   : > { %1866 = vrot.lane.b32.xlu0 %v1864_v40, %s3015_s12 }
0x19bc   : > { %v1867_v41 = vpop.permute.xlu0 %1866 }
0x19bd   : > { %v1869_v42 = vmul.f32 %v1867_v41, %v1857_v24  ;;  %v1870_v43 = vmul.f32 %v1867_v41, %v1858_v25  ;;  %v2169_v24 = vld [vmem:[%s3493_s4 + $0x68] sm:$0xff] }
0x19be   : > { %v2781_v25 = vpack.c.bf16 %v2169_v24, %v2168_v23 }
0x19bf   : > { %v1871_v44 = vmax.f32 %v1869_v42, 0.0  ;;  %v1872_v45 = vmax.f32 %v1870_v43, 0.0 }
0x19c1   : > { %2654 = vmatprep.mubr.msk.f32.mxu1 %vm363_vm1, %v1871_v44 }
0x19c2   : > { %2655 = vmatmul.mubr.msk.f32.vlgmr.msra.gmra.mrb[8].mxu1 %vm363_vm1, %v1872_v45 }
0x19c3   : > { %2764 = vmatpush1.bf16.msra.mxu1 %v2763_v7 }
0x19c4   : > { %2765 = vmatprep.subr.bf16.mxu1 %v3010_v13 }
0x1a95   : > { %v3326_v46 = vpop.f32.mrb[8].mxu1 }
0x1a96   : > { %v1960_v47 = vmul.f32 %v3326_v46, %v3326_v46  ;;  %v3330_v49 = vpop.f32.mrb[9].mxu1 }
0x1a97   : > { %v1959_v50 = vmul.f32 %v3330_v49, %v3330_v49 }
0x1a99   : > { %v2887_v51 = vpack.i.bf16 %v1960_v47, %v1959_v50 }
0x1a9b   : > { %2888 = vrot.lane.b32.xlu1 %v2887_v51, %s3013_s15 }
0x1b0d   : > { %v2889_v52 = vpop.permute.xlu1 %2888 }
0x1b0e   : > { %v2891_v53 = vunpack.i.h.bf16 %v2889_v52  ;;  %v2890_v1 = vunpack.i.l.bf16 %v2889_v52 }
0x1b10   : > { %v1970_v54 = vsel %vm363_vm1, %v3326_v46, %v2891_v53  ;;  %v1969_v55 = vsel %vm363_vm1, %v3330_v49, %v2890_v1 }
0x1b11   : > { %v2757_v56 = vpack.c.bf16 %v1970_v54, %v1969_v55 }
0x1b13   : > { %2758 = vmatpush3.bf16.msra.mxu0 %v2757_v56 }
0x1b14   : > { %2759 = vmatprep.subr.bf16.mxu0 %v3010_v13 }
0x1b16   : > { %2662 = vmatmul.mubr.msk.f32.vlgmr.msra.gmra.mrb[36].mxu0 %vm304_vm0, %v3014_v26 }
0x1b17   : > { %2668 = vmatprep.mubr.msk.f32.mxu0 %vm3011_vm2, %v3012_v14 }
0x1be9   : > { %v2037_v57 = vpop.f32.mrb[36].mxu0 }
0x1bea   : > { %v2041_v58 = vmul.f32 %v2037_v57, %v2037_v57  ;;  %v3345_v59 = vrot.slane %v2037_v57, %v3176_v29  ;;  %v2663_v60 = vpop.f32.mrb[37].mxu0 }
0x1bec   : > { %2043 = vrot.lane.b32.xlu0 %v2041_v58, %s3013_s15  ;;  %v2052_v61 = vsub.f32 %v3330_v49, %v3345_v59  ;;  %v2053_v62 = vsub.f32 %v3326_v46, %v3345_v59 }
0x1bf0   : > { %2139 = vrot.lane.b32.xlu0 %v3213_v31, %s3013_s15  ;;  %v2158_v31 = vld [vmem:[%s3493_s4 + $0x10] sm:$0xff] }
0x1bf4   : > { %2147 = vrot.lane.b32.xlu0 %v3307_v3, %s3015_s12  ;;  %v2159_v3 = vld [vmem:[%s3493_s4 + $0x18] sm:$0xff] }
0x1bf5   : > { %v2766_v10 = vpack.c.bf16 %v2159_v3, %v2158_v31 }
0x1bf7   : > { %2767 = vmatpush1.bf16.msra.mxu1 %v2766_v10 }
0x1bf8   : > { %2768 = vmatprep.subr.bf16.mxu1 %v3010_v13 }
0x1bfb   : > { %2770 = vmatpush1.bf16.msra.mxu1 %v2769_v15 }
0x1bfc   : > { %2771 = vmatprep.subr.bf16.mxu1 %v3010_v13 }
0x1c5e   : > { %v2044_v14 = vpop.permute.xlu0 %2043 }
0x1c5f   : > { %v2046_v63 = vsub.f32 %v2037_v57, %v2044_v14 }
0x1c61   : > { %v2047_v0 = vmax.f32 %v2046_v63, 0.0 }
0x1c62   : > { %v2140_v44 = vpop.permute.xlu0 %2139 }
0x1c63   : > { %v2054_v4 = vadd.f32 1e-05, %v2047_v0  ;;  %v2150_v45 = vsel %vm363_vm1, %v3164_v9, %v2140_v44 }
0x1c65   : > { %2909 = vrsqrt.f32 %v2054_v4 }
0x1c66   : > { %v2148_v49 = vpop.permute.xlu0 %2147 }
0x1c6f   : > { %v2910_v6 = vpop.eup %2909 }
0x1c70   : > { %v2059_v8 = vrot.slane %v2910_v6, %v3176_v29  ;;  %v2162_v29 = vld [vmem:[%s3493_s4 + $0x30] sm:$0xff] }
0x1c71   : > { %v2772_v17 = vpack.c.bf16 %v2163_v16, %v2162_v29 }
0x1c72   : > { %2061 = vrot.lane.b32.xlu1 %v2059_v8, %s3015_s12  ;;  %s273_s12 = scalar_lea.vmem [#allocation5], %s272_s10 }
0x1c73   : > { %2773 = vmatpush1.bf16.msra.mxu1 %v2772_v17  ;;  %s2268_s14 = sshll.u32 %s273_s12, 4  ;;  %s3449_s14 = int_to_ptr.vmem [resolvable:$true] %s2268_s14 }
0x1c74   : > { %2774 = vmatprep.subr.bf16.mxu1 %v3010_v13  ;;  %s2939_s15 = scalar_lea.vmem %s3449_s14, 16  ;;  %p2946_p2 = scmp.lt.s32.totalorder %s3449_s14, %s2944_s9 }
0x1c75   : > { %p2940_p6 = scmp.ne.s32.totalorder %s3449_s14, %s2939_s15  ;;  %p2947_p3 = scmp.lt.s32.totalorder %s2945_s19, %s2939_s15 }
0x1c76   : > { %2143 = vrot.lane.b32.xlu1 %v3261_v48, %s3016_s29  ;;  %v2165_v48 = vld [vmem:[%s3493_s4 + $0x48] sm:$0xff] }
0x1c77   : > { %v2775_v19 = vpack.c.bf16 %v2165_v48, %v2164_v18  ;;  %p2941_p10 = pnand %p2940_p6, %p3506_p9  ;;  %p2948_p4 = por %p2947_p3, %p2946_p2 }
0x1c79   : > { %2776 = vmatpush1.bf16.msra.mxu1 %v2775_v19  ;;  %p2942_p12 = pneg %p2941_p10 }
0x1c7a   : > { %2777 = vmatprep.subr.bf16.mxu1 %v3010_v13 }
0x1c7b   : > { %p2949_p7 = pnand %p2948_p4, %p2942_p12 }
0x1c7d   : > { %2779 = vmatpush1.bf16.msra.mxu1 %v2778_v22 }
0x1c7e   : > { %2780 = vmatprep.subr.bf16.mxu1 %v3010_v13 }
0x1c81   : > { %2782 = vmatpush1.bf16.msra.mxu1 %v2781_v25 }
0x1c82   : > { %2783 = vmatprep.subr.bf16.mxu1 %v3010_v13 }
0x1c85   : > { %2785 = vmatpush1.bf16.msra.mxu1 %v2784_v30 }
0x1c86   : > { %2786 = vmatprep.subr.bf16.mxu1 %v3010_v13 }
0x1c89   : > { %2788 = vmatpush1.bf16.msra.mxu1 %v2787_v34 }
0x1c8a   : > { %2789 = vmatprep.subr.bf16.mxu1 %v3010_v13 }
0x1c8d   : > { %2791 = vmatpush1.bf16.msra.mxu1 %v2790_v37 }
0x1ce4   : > { %v2062_v38 = vpop.permute.xlu1 %2061 }
0x1ce5   : > { %v2064_v39 = vmul.f32 %v2062_v38, %v2052_v61  ;;  %v2065_v40 = vmul.f32 %v2062_v38, %v2053_v62 }
0x1ce7   : > { %v2066_v41 = vmax.f32 %v2064_v39, 0.0  ;;  %v2067_v42 = vmax.f32 %v2065_v40, 0.0 }
0x1ce8   : > { %v2144_v13 = vpop.permute.xlu1 %2143 }
0x1ce9   : > { %v2760_v43 = vpack.c.bf16 %v2067_v42, %v2066_v41  ;;  %v2152_v47 = vsel %vm2151_vm3, %v2150_v45, %v2144_v13 }
0x1cea   : > { %v2154_v50 = vsel %vm2153_vm4, %v2152_v47, %v2148_v49 }
0x1ceb   : > { %2761 = vmatpush3.bf16.msra.mxu0 %v2760_v43 }
0x1cee   : > { %2669 = vmatmul.mubr.msk.f32.vlgmr.msra.gmra.mrb[38].mxu0 %vm304_vm0, %v3014_v26  ;;  %v2155_v26 = vld [vmem:[%s3494_s5] sm:$0x1] }
0x1dc1   : > { %v2134_v46 = vpop.f32.mrb[38].mxu0 }
0x1dc2   : > { %2404 = vmatprep.mubr.msk.f32.mxu1 %vm363_vm1, %v2134_v46  ;;  %v2670_v51 = vpop.f32.mrb[39].mxu0 }
0x1dc3   : > { %2244 = vmatmul.mubr.f32.vlgmr.msra.gmra.mrb[10].mxu1 %v2154_v50 }
0x1e96   : > { %v2245_v52 = vpop.f32.mrb[10].mxu1 }
0x1e97   : > { %v2249_v53 = vadd.f32 %v2245_v52, %v2155_v26  ;;  %v2247_v1 = vpop.f32.mrb[11].mxu1 }
0x1e99   : > { %v2250_v54 = vadd.f32 0.5, %v2249_v53 }
0x1e9b   : > { %v2251_v9 = vmax.f32 %v2250_v54, 0.0 }
0x1e9d   : > { %v2252_v55 = vmin.f32 %v2251_v9, 1.0 }
0x1e9f   : > { %2254 = vst.msk [vmem:[%s273_s12] sm:$0x1] %vm2253_vm5, %v2252_v55 }
0x1ea0   : > { %2952 = shalt.err (!%p2949_p7)
}
0x1ea1   : > { %s2953_s20 = scalar_lea.hbm %s3447_s11, 16  ;;  %s2957_s29 = scalar_lea.hbm %s3495_s6, 32 }
0x1ea2   : > { %p2954_p8 = scmp.ne.s32.totalorder %s3447_s11, %s2953_s20  ;;  %p2958_p1 = scmp.lt.u32.totalorder %s3447_s11, %s3495_s6 }
0x1ea3   : > { %p2959_p0 = scmp.lt.u32.totalorder %s2957_s29, %s2953_s20  ;;  %p2961_p6 = scmp.lt.u32.totalorder %s2953_s20, %s3447_s11 }
0x1ea4   : > { %p2955_p11 = pnand %p2954_p8, %p3506_p9 }
0x1ea5   : > { %p2960_p5 = por %p2959_p0, %p2958_p1 }
0x1ea6   : > { %p2956_p13 = pneg %p2955_p11 }
0x1ea7   : > { %p2962_p10 = por %p2961_p6, %p2960_p5 }
0x1ea9   : > { %p2963_p12 = pnand %p2962_p10, %p2956_p13 }
0x1eab   : > { %2966 = shalt.err (!%p2963_p12)
}
0x1eac   : > { %2797 = dma.vmem_to_hbm [thread:$0]  (%p3506_p9), %s3449_s14, 16, %s3447_s11, %s2256_s18  }
0x1ead PF: > { %p2809_p2 = scmp.ge.s32.totalorder %s3005_s24, 2  ;;  %s2280_s12 = sand.u32 1, %s2993_s21  }
0x1eae   : > { %p3507_p3 = scmp.ne.s32.totalorder %s3500_s8, 0  ;;  %s2281_s16 = scalar_lea.sflag [#allocation4], %s2280_s12 }
0x1eb0   : > { %p2804_p4 = pnand %p2809_p2, %p3507_p3 }
0x1eb2   : > { %2988 = dma.done.wait (!%p2804_p4), %s2281_s16, 16  }
0x1eb3   : > { %2990 = vsyncadd (!%p2804_p4), %s2281_s16, 4294967280  ;;  %p17_p7 = scmp.ge.s32.totalorder %s3078_s27, 4   ;;  %s3508_s21 = smov %s2997_s22 }
0x1eb4   : > { %s3509_s22 = smov %s3001_s23  ;;  %s3510_s23 = smov %s3089_s30 }
0x1eb5   : > { %s3511_s24 = smov %s3078_s27  ;;  %19 = sbr.rel (!%p17_p7) target bundleno = 4 (0x4), region = 93 }
0x1ebc   :  { %2285 = vsyncpa [#allocation3], 1 }
0x1ebd   :  { %2287 = vsyncpa [#allocation3 + $0x1], 1 }
0x1ebe   :  { %2288 = vsyncpa [#allocation4], 1 }
0x1ebf   :  { %2290 = vsyncpa [#allocation4 + $0x1], 1 }

</bundles_post_ra>
